<compile_context>
chip_gen: v7x
topology: tpu7x:2x2x1
jax: 0.10.0
libtpu: 0.0.40
codegen_flags: <defaults>
</compile_context>

<pallas_src>
import jax
import jax.numpy as jnp
from jax.experimental import pallas as pl
from jax.experimental.pallas import tpu as pltpu


def discriminator_kernel(x_ref, w1_ref, b1_ref, w2_ref, b2_ref, w3_ref, b3_ref, o_ref):
    # x_ref: [hash_bit, tile] f32, batch on the lane axis.  Cast to bf16 on the VPU
    # here (rides idle VPU slots under the MXU work) instead of a wrapper-side pass.
    x_bf = x_ref[...].astype(jnp.bfloat16)

    # Layer 1: [512, hash_bit] @ [hash_bit, tile] -> [512, tile] (MXU, f32 acc).
    h1 = jnp.dot(w1_ref[...], x_bf, preferred_element_type=jnp.float32) + b1_ref[...]
    h1 = jnp.maximum(h1, 0.2 * h1)            # LeakyReLU(0.2), f32 on the VPU

    # Layer 2: [128, 512] @ [512, tile] -> [128, tile]; N = tile >= 256 fills the MXU.
    h2 = jnp.dot(w2_ref[...], h1.astype(jnp.bfloat16),
                 preferred_element_type=jnp.float32) + b2_ref[...]
    h2 = jnp.maximum(h2, 0.2 * h2)

    # Layer 3 (out_features == 1): kept off the MXU.  VPU multiply with the [128, 1]
    # weight column + sublane reduction; the [1, tile] result is already lane-dense.
    out = jnp.sum(h2 * w3_ref[...], axis=0, keepdims=True) + b3_ref[...]
    o_ref[...] = out.astype(o_ref.dtype)


def _choose_batch_tile(batch, max_tile=2048):
    # Multiple of 256 (full 256-wide MXU on v6e/v7x, 2x the 128-wide v5e MXU).
    # Keep >= 2 grid steps when possible so v7x's two TensorCores both get work.
    if batch <= 256:
        return 256
    half = -(-batch // 2)                      # ceil(batch / 2)
    return min(max_tile, -(-half // 256) * 256)


def discriminator_forward(x, params, *, batch_tile=None):
    """x: [B, hash_bit] float32 -> [B, 1] float32."""
    w1, b1, w2, b2, w3, b3 = params            # PyTorch layout: W_k is [out, in]
    B, hash_bit = x.shape
    h0 = w1.shape[0]                           # 512
    h1d = w2.shape[0]                          # 128

    if batch_tile is None:
        batch_tile = _choose_batch_tile(B)
    num_tiles = pl.cdiv(B, batch_tile)
    b_pad = num_tiles * batch_tile

    if b_pad != B:
        x = jnp.pad(x, ((0, b_pad - B), (0, 0)))
    xT = x.T                                   # [hash_bit, b_pad]: batch on lanes

    # Resident operands: matmul weights pre-cast to bf16; biases / final layer in f32.
    w1_bf = w1.astype(jnp.bfloat16)            # [512, hash_bit]
    w2_bf = w2.astype(jnp.bfloat16)            # [128, 512]
    b1_col = b1.reshape(h0, 1).astype(jnp.float32)
    b2_col = b2.reshape(h1d, 1).astype(jnp.float32)
    w3_col = w3.reshape(h1d, 1).astype(jnp.float32)
    b3_s = b3.reshape(1, 1).astype(jnp.float32)

    flops = 2 * b_pad * (hash_bit * h0 + h0 * h1d + h1d)
    bytes_accessed = (xT.size * 4 + w1_bf.size * 2 + w2_bf.size * 2
                      + (b1_col.size + b2_col.size + w3_col.size + b3_s.size) * 4
                      + b_pad * 4)

    res = lambda shape: pl.BlockSpec(shape, lambda i: (0, 0))   # constant-index residents

    out = pl.pallas_call(
        discriminator_kernel,
        out_shape=jax.ShapeDtypeStruct((1, b_pad), jnp.float32),
        grid_spec=pltpu.PrefetchScalarGridSpec(
            num_scalar_prefetch=0,
            grid=(num_tiles,),
            in_specs=[
                pl.BlockSpec((hash_bit, batch_tile), lambda i: (0, i)),  # xT tile (streamed f32)
                res((h0, hash_bit)),    # w1  (bf16, resident)
                res((h0, 1)),           # b1  column
                res((h1d, h0)),         # w2  (bf16, resident)
                res((h1d, 1)),          # b2  column
                res((h1d, 1)),          # w3  column (f32, VPU/XLU final layer)
                res((1, 1)),            # b3
            ],
            out_specs=pl.BlockSpec((1, batch_tile), lambda i: (0, i)),   # lane-dense output
        ),
        compiler_params=pltpu.CompilerParams(
            dimension_semantics=("parallel",),
        ),
        cost_estimate=pl.CostEstimate(
            flops=flops, transcendentals=0, bytes_accessed=bytes_accessed),
    )(xT, w1_bf, b1_col, w2_bf, b2_col, w3_col, b3_s)

    # [1, b_pad] -> [B, 1] (row-major flatten preserves batch order).
    return out.reshape(b_pad, 1)[:B]


def init_params(key, hash_bit):
    """PyTorch nn.Linear default init (uniform +-1/sqrt(fan_in)), torch layout [out, in]."""
    dims = [(hash_bit, 512), (512, 128), (128, 1)]
    params = []
    for fan_in, fan_out in dims:
        key, kw, kb = jax.random.split(key, 3)
        bound = 1.0 / (fan_in ** 0.5)
        w = jax.random.uniform(kw, (fan_out, fan_in), jnp.float32, -bound, bound)
        b = jax.random.uniform(kb, (fan_out,), jnp.float32, -bound, bound)
        params.extend([w, b])
    return tuple(params)


def reference_forward(x, params):
    """Pure-JAX reference mirroring the kernel's precision choices (bf16 operands into
    the MXU, f32 accumulation, f32 bias / leaky-relu, f32 final layer)."""
    w1, b1, w2, b2, w3, b3 = params
    h = jnp.dot(x.astype(jnp.bfloat16), w1.T.astype(jnp.bfloat16),
                preferred_element_type=jnp.float32) + b1
    h = jnp.maximum(h, 0.2 * h)
    h = jnp.dot(h.astype(jnp.bfloat16), w2.T.astype(jnp.bfloat16),
                preferred_element_type=jnp.float32) + b2
    h = jnp.maximum(h, 0.2 * h)
    return jnp.dot(h, w3.T) + b3


if __name__ == "__main__":
    hash_bit = 32
    batch = 500   # not a multiple of the tile: exercises padding; > 256 -> 2 grid steps

    key = jax.random.PRNGKey(0)
    key, kx = jax.random.split(key)
    x = jax.random.normal(kx, (batch, hash_bit), jnp.float32)
    params = init_params(key, hash_bit)

    out = discriminator_forward(x, params)
    out = jax.block_until_ready(out)

    ref = reference_forward(x, params)
    assert out.shape == (batch, 1), out.shape
    err = jnp.max(jnp.abs(out - ref))
    assert jnp.allclose(out, ref, atol=1e-3, rtol=1e-3), f"mismatch vs reference, max abs err {err}"

    print("KERNEL_OK")
</pallas_src>

<mosaic_0001>
module attributes {stable_mosaic.version = 11 : i64} {
  func.func @discriminator_kernel(%arg0: i32, %arg1: memref<32x256xf32, #tpu.memory_space<vmem>>, %arg2: memref<512x32xbf16, #tpu.memory_space<vmem>>, %arg3: memref<512x1xf32, #tpu.memory_space<vmem>>, %arg4: memref<128x512xbf16, #tpu.memory_space<vmem>>, %arg5: memref<128x1xf32, #tpu.memory_space<vmem>>, %arg6: memref<128x1xf32, #tpu.memory_space<vmem>>, %arg7: memref<1x1xf32, #tpu.memory_space<vmem>>, %arg8: memref<1x256xf32, #tpu.memory_space<vmem>>) attributes {dimension_semantics = [#tpu.dimension_semantics<parallel>], iteration_bounds = array<i64: 2>, scalar_prefetch = 0 : i64, scratch_operands = 0 : i64, tpu.core_type = #tpu.core_type<tc>, window_params = [{transform_indices = @transform_0, window_bounds = array<i64: 32, 256>}, {pipeline_mode = #tpu.pipeline_mode<synchronous>, transform_indices = @transform_1, window_bounds = array<i64: 512, 32>}, {pipeline_mode = #tpu.pipeline_mode<synchronous>, transform_indices = @transform_2, window_bounds = array<i64: 512, 1>}, {pipeline_mode = #tpu.pipeline_mode<synchronous>, transform_indices = @transform_3, window_bounds = array<i64: 128, 512>}, {pipeline_mode = #tpu.pipeline_mode<synchronous>, transform_indices = @transform_4, window_bounds = array<i64: 128, 1>}, {pipeline_mode = #tpu.pipeline_mode<synchronous>, transform_indices = @transform_5, window_bounds = array<i64: 128, 1>}, {pipeline_mode = #tpu.pipeline_mode<synchronous>, transform_indices = @transform_6, window_bounds = array<i64: 1, 1>}, {transform_indices = @transform_7, window_bounds = array<i64: 1, 256>}]} {
    %c0 = arith.constant 0 : index
    %c0_0 = arith.constant 0 : index
    %0 = vector.load %arg1[%c0, %c0_0] : memref<32x256xf32, #tpu.memory_space<vmem>>, vector<32x256xf32>
    %1 = arith.truncf %0 : vector<32x256xf32> to vector<32x256xbf16>
    %c0_1 = arith.constant 0 : index
    %c0_2 = arith.constant 0 : index
    %2 = vector.load %arg2[%c0_1, %c0_2] : memref<512x32xbf16, #tpu.memory_space<vmem>>, vector<512x32xbf16>
    %cst = arith.constant dense<0.000000e+00> : vector<512x256xf32>
    %3 = tpu.matmul %2, %1, %cst {dimension_numbers = #tpu.dot_dimension_numbers<[1], [0], [0], [1], [0, 0, 1, 1], [], []>} : vector<512x32xbf16>, vector<32x256xbf16>, vector<512x256xf32> -> vector<512x256xf32>
    %c0_3 = arith.constant 0 : index
    %c0_4 = arith.constant 0 : index
    %4 = vector.load %arg3[%c0_3, %c0_4] : memref<512x1xf32, #tpu.memory_space<vmem>>, vector<512x1xf32>
    %5 = vector.broadcast %4 : vector<512x1xf32> to vector<512x256xf32>
    %6 = arith.addf %3, %5 : vector<512x256xf32>
    %cst_5 = arith.constant 2.000000e-01 : f32
    %7 = vector.broadcast %cst_5 : f32 to vector<512x256xf32>
    %8 = arith.mulf %7, %6 : vector<512x256xf32>
    %9 = arith.maximumf %6, %8 : vector<512x256xf32>
    %c0_6 = arith.constant 0 : index
    %c0_7 = arith.constant 0 : index
    %10 = vector.load %arg4[%c0_6, %c0_7] : memref<128x512xbf16, #tpu.memory_space<vmem>>, vector<128x512xbf16>
    %11 = arith.truncf %9 : vector<512x256xf32> to vector<512x256xbf16>
    %cst_8 = arith.constant dense<0.000000e+00> : vector<128x256xf32>
    %12 = tpu.matmul %10, %11, %cst_8 {dimension_numbers = #tpu.dot_dimension_numbers<[1], [0], [0], [1], [0, 0, 1, 1], [], []>} : vector<128x512xbf16>, vector<512x256xbf16>, vector<128x256xf32> -> vector<128x256xf32>
    %c0_9 = arith.constant 0 : index
    %c0_10 = arith.constant 0 : index
    %13 = vector.load %arg5[%c0_9, %c0_10] : memref<128x1xf32, #tpu.memory_space<vmem>>, vector<128x1xf32>
    %14 = vector.broadcast %13 : vector<128x1xf32> to vector<128x256xf32>
    %15 = arith.addf %12, %14 : vector<128x256xf32>
    %cst_11 = arith.constant 2.000000e-01 : f32
    %16 = vector.broadcast %cst_11 : f32 to vector<128x256xf32>
    %17 = arith.mulf %16, %15 : vector<128x256xf32>
    %18 = arith.maximumf %15, %17 : vector<128x256xf32>
    %c0_12 = arith.constant 0 : index
    %c0_13 = arith.constant 0 : index
    %19 = vector.load %arg6[%c0_12, %c0_13] : memref<128x1xf32, #tpu.memory_space<vmem>>, vector<128x1xf32>
    %20 = vector.broadcast %19 : vector<128x1xf32> to vector<128x256xf32>
    %21 = arith.mulf %18, %20 : vector<128x256xf32>
    %cst_14 = arith.constant dense<0.000000e+00> : vector<256xf32>
    %22 = vector.multi_reduction <add>, %21, %cst_14 [0] : vector<128x256xf32> to vector<256xf32>
    %23 = vector.shape_cast %22 : vector<256xf32> to vector<1x256xf32>
    %c0_15 = arith.constant 0 : index
    %c0_16 = arith.constant 0 : index
    %24 = vector.load %arg7[%c0_15, %c0_16] : memref<1x1xf32, #tpu.memory_space<vmem>>, vector<1x1xf32>
    %25 = vector.broadcast %24 : vector<1x1xf32> to vector<1x256xf32>
    %26 = arith.addf %23, %25 : vector<1x256xf32>
    %c0_17 = arith.constant 0 : index
    %c0_18 = arith.constant 0 : index
    %27 = vector.load %arg8[%c0_17, %c0_18] : memref<1x256xf32, #tpu.memory_space<vmem>>, vector<1x256xf32>
    tpu.vector_store %arg8[%c0_17, %c0_18], %26 {strides = array<i32>} : memref<1x256xf32, #tpu.memory_space<vmem>>, vector<1x256xf32>,
    return
  }
  func.func @transform_0(%arg0: i32) -> (i32, i32) {
    %c0_i32 = arith.constant 0 : i32
    %c0_i32_0 = arith.constant 0 : i32
    return %c0_i32, %arg0 : i32, i32
  }
  func.func @transform_1(%arg0: i32) -> (i32, i32) {
    %c0_i32 = arith.constant 0 : i32
    %c0_i32_0 = arith.constant 0 : i32
    %c0_i32_1 = arith.constant 0 : i32
    return %c0_i32, %c0_i32_0 : i32, i32
  }
  func.func @transform_2(%arg0: i32) -> (i32, i32) {
    %c0_i32 = arith.constant 0 : i32
    %c0_i32_0 = arith.constant 0 : i32
    %c0_i32_1 = arith.constant 0 : i32
    return %c0_i32, %c0_i32_0 : i32, i32
  }
  func.func @transform_3(%arg0: i32) -> (i32, i32) {
    %c0_i32 = arith.constant 0 : i32
    %c0_i32_0 = arith.constant 0 : i32
    %c0_i32_1 = arith.constant 0 : i32
    return %c0_i32, %c0_i32_0 : i32, i32
  }
  func.func @transform_4(%arg0: i32) -> (i32, i32) {
    %c0_i32 = arith.constant 0 : i32
    %c0_i32_0 = arith.constant 0 : i32
    %c0_i32_1 = arith.constant 0 : i32
    return %c0_i32, %c0_i32_0 : i32, i32
  }
  func.func @transform_5(%arg0: i32) -> (i32, i32) {
    %c0_i32 = arith.constant 0 : i32
    %c0_i32_0 = arith.constant 0 : i32
    %c0_i32_1 = arith.constant 0 : i32
    return %c0_i32, %c0_i32_0 : i32, i32
  }
  func.func @transform_6(%arg0: i32) -> (i32, i32) {
    %c0_i32 = arith.constant 0 : i32
    %c0_i32_0 = arith.constant 0 : i32
    %c0_i32_1 = arith.constant 0 : i32
    return %c0_i32, %c0_i32_0 : i32, i32
  }
  func.func @transform_7(%arg0: i32) -> (i32, i32) {
    %c0_i32 = arith.constant 0 : i32
    %c0_i32_0 = arith.constant 0 : i32
    return %c0_i32, %arg0 : i32, i32
  }
}

</mosaic_0001>

<bundles_post_ra>
// kernel: tpu_custom_call.1
= control target key start
LH: loop header
LB: loop body
LE: loop exit
PB: predicated region body
PF: predicated region fallthrough
CT: control target
= control target key end

     0   :  { %s3910_s0 = inlined_call_operand.vmem [shape: f32[32,512], index: 0, kind: input, shape index: {}]   ;;  %s3911_s1 = inlined_call_operand.vmem [shape: bf16[512,32], index: 1, kind: input, shape index: {}]   ;;  %s3912_s2 = inlined_call_operand.vmem [shape: f32[512,1], index: 2, kind: input, shape index: {}]   ;;  %s3913_s3 = inlined_call_operand.vmem [shape: bf16[128,512], index: 3, kind: input, shape index: {}]   ;;  %s3914_s4 = inlined_call_operand.vmem [shape: f32[128,1], index: 4, kind: input, shape index: {}]   ;;  %s3915_s5 = inlined_call_operand.vmem [shape: f32[128,1], index: 5, kind: input, shape index: {}]   ;;  %s3916_s6 = inlined_call_operand.<no memory space> [shape: f32[1,1], index: 6, kind: input, shape index: {}]   ;;  %s3917_s7 = inlined_call_operand.hbm [shape: f32[1,512], index: 7, kind: output, shape index: {}]  }
   0x1   :  { %v12_v0 = vstv %s3916_s6 }
   0x2   :  { %13 = vst [vmem:[#allocation2] sm:$0x1] %v12_v0 }
   0x3   :  { %14 = vsyncpa [#allocation5], 0 }
   0x4   :  { %16 = vsyncpa [#allocation5 + $0x1], 0  ;;  %s2982_s26 = smov 0   ;;  %s2984_s27 = smov 0  }
   0x5   :  { %s2986_s28 = smov 0   ;;  %s2988_s29 = smov 0  }
   0x6 LB: > { %s2568_s6 = sadd.s32 4294967295, %s2934_s29   ;;  %s2569_s30 = sadd.s32 4294967294, %s2934_s29   ;;  %s2934_s29 = sphi %s2988_s29, %s3968_s29   ;;  %s2930_s28 = sphi %s2986_s28, %s3967_s28   ;;  %s2926_s27 = sphi %s2984_s27, %s3966_s27   ;;  %s2922_s26 = sphi %s2982_s26, %s3965_s26  }
   0x7   : > { %s3005_s8 = sadd.s32 1, %s2934_s29   ;;  %s29_s9 = sadd.s32 1, %s2930_s28 }
   0x8   : > { %s26_s10 = ssub.s32 %s2934_s29, %s3005_s8  ;;  %p36_p0 = scmp.ne.s32.totalorder %s2930_s28, %s2926_s27 }
   0x9   : > { %p27_p1 = scmp.eq.s32.totalorder %s26_s10, 0  ;;  %p37_p2 = scmp.eq.s32.totalorder %s2934_s29, 0 }
   0xa   : > { %p192_p3 = scmp.eq.s32.totalorder %s2568_s6, 1  ;;  %p197_p4 = scmp.ne.s32.totalorder %s2926_s27, %s2922_s26 }
   0xb   : > { %s3018_s11 = scalar_select %p27_p1, %s2930_s28, %s29_s9  }
   0xc   : > { %p38_p5 = por %p37_p2, %p36_p0  ;;  %p3020_p6 = por %p192_p3, %p36_p0 }
   0xd   : > { %p198_p7 = scmp.eq.s32.totalorder %s2569_s30, 1  ;;  %p2571_p9 = scmp.ge.s32.totalorder %s2934_s29, 2 }
   0xf   : > { %p3024_p8 = por %p198_p7, %p197_p4  ;;  %232 = sbr.rel (%p2571_p9) target bundleno = 30 (0x1e), region = 40 }
  0x16   : > { %235 = sbr.rel (!%p38_p5) target bundleno = 30 (0x1e), region = 44  ;;  %s237_s14 = sand.u32 (%p38_p5), 1, %s2930_s28  }
  0x17   : > { %s2679_s15 = sshll.u32 (%p38_p5), %s2934_s29, 4  ;;  %s2572_s16 = sshll.u32 (%p38_p5), %s237_s14, 6 }
  0x18   : > { %s242_s19 = scalar_lea.vmem (%p38_p5), %s3910_s0, %s2679_s15  ;;  %s239_s20 = scalar_lea.vmem (%p38_p5), [#allocation3], %s2572_s16 }
  0x19   : > { %v255_v1 = vld [vmem:[%s242_s19] sm:$0xff] (%p38_p5)  ;;  %v257_v2 = vld [vmem:[%s242_s19 + $0x8] sm:$0xff] (%p38_p5) }
  0x1a   : > { %v259_v3 = vld [vmem:[%s242_s19 + $0x20] sm:$0xff] (%p38_p5)  ;;  %256 = vst [vmem:[%s239_s20] sm:$0xff] (%p38_p5), %v255_v1  ;;  %258 = vst [vmem:[%s239_s20 + $0x8] sm:$0xff] (%p38_p5), %v257_v2  ;;  %v261_v4 = vld [vmem:[%s242_s19 + $0x28] sm:$0xff] (%p38_p5) }
  0x1b   : > { %260 = vst [vmem:[%s239_s20 + $0x10] sm:$0xff] (%p38_p5), %v259_v3  ;;  %v263_v5 = vld [vmem:[%s242_s19 + $0x40] sm:$0xff] (%p38_p5)  ;;  %v265_v6 = vld [vmem:[%s242_s19 + $0x48] sm:$0xff] (%p38_p5)  ;;  %262 = vst [vmem:[%s239_s20 + $0x18] sm:$0xff] (%p38_p5), %v261_v4 }
  0x1c   : > { %264 = vst [vmem:[%s239_s20 + $0x20] sm:$0xff] (%p38_p5), %v263_v5  ;;  %266 = vst [vmem:[%s239_s20 + $0x28] sm:$0xff] (%p38_p5), %v265_v6  ;;  %v267_v7 = vld [vmem:[%s242_s19 + $0x60] sm:$0xff] (%p38_p5)  ;;  %v269_v8 = vld [vmem:[%s242_s19 + $0x68] sm:$0xff] (%p38_p5) }
  0x1d   : > { %268 = vst [vmem:[%s239_s20 + $0x30] sm:$0xff] %v267_v7  ;;  %270 = vst [vmem:[%s239_s20 + $0x38] sm:$0xff] %v269_v8 }
  0x1e PF: > { %p2575_p10 = scmp.ge.s32.totalorder %s2934_s29, 1  ;;  %p275_p11 = scmp.lt.s32.totalorder %s2934_s29, 3 }
  0x20   : > { %p276_p12 = pnand %p2575_p10, %p275_p11 }
  0x22   : > { %279 = sbr.rel (%p276_p12) target bundleno = 813 (0x32d), region = 67 }
  0x29   : > { %v392_v9 = vld [vmem:[%s3912_s2] sm:$0xff]  ;;  %v394_v10 = vld [vmem:[%s3912_s2 + $0x10] sm:$0xff]  ;;  %s3045_s25 = sand.u32 1, %s2926_s27   ;;  %v2936_v11 = vmov 0   ;;  %v393_v12 = vld [vmem:[%s3912_s2 + $0x8] sm:$0xff]  ;;  %vm936_vm0 = vcmask 261120  }
  0x2a   : > { %2790 = vset.pattern.permute.xlu0 %v2936_v11  ;;  %2791 = vset.pattern.permute.xlu1 %v2936_v11  ;;  %s2576_s10 = sshll.u32 %s3045_s25, 6  ;;  %v395_v13 = vld [vmem:[%s3912_s2 + $0x18] sm:$0xff]  ;;  %v396_v25 = vld [vmem:[%s3912_s2 + $0x20] sm:$0xff]  ;;  %v397_v27 = vld [vmem:[%s3912_s2 + $0x28] sm:$0xff]  ;;  %s2577_s21 = sshll.u32 %s3045_s25, 1 }
  0x2b   : > { %458 = vperm.xlu0 %2790, %v392_v9   ;;  %468 = vperm.xlu1 %2791, %v394_v10   ;;  %s284_s16 = scalar_lea.vmem [#allocation3], %s2576_s10  ;;  %v2792_v28 = vld [vmem:[%s3911_s1] sm:$0xff]   ;;  %v398_v29 = vld [vmem:[%s3912_s2 + $0x30] sm:$0xff]  ;;  %v399_v30 = vld [vmem:[%s3912_s2 + $0x38] sm:$0xff]  ;;  %s2680_s22 = sshll.u32 %s2568_s6, 5 }
  0x2c   : > { %v317_v14 = vld [vmem:[%s284_s16 + $0x8] sm:$0xff]  ;;  %v319_v15 = vld [vmem:[%s284_s16 + $0x18] sm:$0xff]  ;;  %v316_v16 = vld [vmem:[%s284_s16] sm:$0xff]  ;;  %1065 = vmatprep.mubr.bf16.mxu0 %v2936_v11  ;;  %1305 = vmatprep.mubr.bf16.mxu1 %v2936_v11  ;;  %s312_s23 = scalar_lea.vmem [#allocation4], %s2577_s21  ;;  %s3866_s10 = scalar_lea.hbm %s3917_s7, %s2680_s22 }
  0x2d   : > { %v325_v17 = vpack.c.bf16 %v319_v15, %v317_v14  ;;  %v318_v18 = vld [vmem:[%s284_s16 + $0x10] sm:$0xff]  ;;  %v321_v19 = vld [vmem:[%s284_s16 + $0x28] sm:$0xff]  ;;  %v323_v20 = vld [vmem:[%s284_s16 + $0x38] sm:$0xff]  ;;  %s2504_s24 = sshll.u32 %s312_s23, 4  ;;  %s2490_s14 = scalar_lea.sflag [#allocation5], %s3045_s25  ;;  %s3868_s24 = int_to_ptr.vmem [resolvable:$true] %s2504_s24 }
  0x2e   : > { %v324_v21 = vpack.c.bf16 %v318_v18, %v316_v16  ;;  %v327_v22 = vpack.c.bf16 %v323_v20, %v321_v19  ;;  %v320_v23 = vld [vmem:[%s284_s16 + $0x20] sm:$0xff]  ;;  %v322_v24 = vld [vmem:[%s284_s16 + $0x30] sm:$0xff]  ;;  %s2872_s15 = scalar_lea.vmem %s3868_s24, 32  ;;  %s2938_s6 = smov [#allocation4]  }
  0x2f   : > { %463 = vperm.xlu0 %2790, %v393_v12   ;;  %1033 = vmatprep.subr.bf16.mxu0 %v325_v17  ;;  %v326_v26 = vpack.c.bf16 %v322_v24, %v320_v23  ;;  %v2796_v31 = vld [vmem:[%s3911_s1 + $0xc0] sm:$0xff]   ;;  %v401_v33 = vld [vmem:[%s3912_s2 + $0x48] sm:$0xff]  ;;  %v402_v35 = vld [vmem:[%s3912_s2 + $0x50] sm:$0xff]  ;;  %p2873_p13 = scmp.ne.s32.totalorder %s3868_s24, %s2872_s15  ;;  %s2876_s16 = sshll.u32 %s2938_s6, 4  ;;  %s2877_s16 = int_to_ptr.vmem [resolvable:$false] %s2876_s16 }
  0x30   : > { %1034 = vmatpush1.bf16.msra.mxu0 %v324_v21  ;;  %473 = vperm.xlu1 %2791, %v395_v13   ;;  %v400_v32 = vld [vmem:[%s3912_s2 + $0x40] sm:$0xff]  ;;  %v2793_v34 = vld [vmem:[%s3911_s1 + $0x8] sm:$0xff]   ;;  %v403_v36 = vld [vmem:[%s3912_s2 + $0x58] sm:$0xff]  ;;  %s2878_s17 = scalar_lea.vmem %s2877_s16, 64  ;;  %p2879_p2 = scmp.lt.s32.totalorder %s3868_s24, %s2877_s16 }
  0x31   : > { %1035 = vmatprep.subr.bf16.mxu0 %v327_v22  ;;  %2681 = vmatprep.subr.bf16.mxu1 %v325_v17  ;;  %v2798_v37 = vld [vmem:[%s3911_s1 + $0xc8] sm:$0xff]   ;;  %v404_v38 = vld [vmem:[%s3912_s2 + $0x60] sm:$0xff]  ;;  %v2794_v40 = vld [vmem:[%s3911_s1 + $0x10] sm:$0xff]   ;;  %p2874_p0 = pnand %p2873_p13, %p3020_p6  ;;  %p2880_p3 = scmp.lt.s32.totalorder %s2878_s17, %s2872_s15 }
  0x32   : > { %2683 = vmatpush1.bf16.msra.mxu1 %v324_v21  ;;  %v405_v39 = vld [vmem:[%s3912_s2 + $0x68] sm:$0xff]  ;;  %v406_v41 = vld [vmem:[%s3912_s2 + $0x70] sm:$0xff]  ;;  %v407_v42 = vld [vmem:[%s3912_s2 + $0x78] sm:$0xff] }
  0x33   : > { %478 = vperm.xlu0 %2790, %v396_v25   ;;  %2682 = vmatprep.subr.bf16.mxu1 %v327_v22  ;;  %v2800_v43 = vld [vmem:[%s3911_s1 + $0xd0] sm:$0xff]   ;;  %v408_v44 = vld [vmem:[%s3912_s2 + $0x80] sm:$0xff]  ;;  %v409_v45 = vld [vmem:[%s3912_s2 + $0x88] sm:$0xff]  ;;  %p2875_p1 = pneg %p2874_p0  ;;  %p2881_p4 = por %p2880_p3, %p2879_p2 }
  0x34   : > { %1036 = vmatpush1.bf16.msra.mxu0 %v326_v26  ;;  %483 = vperm.xlu1 %2791, %v397_v27   ;;  %v2795_v46 = vld [vmem:[%s3911_s1 + $0x18] sm:$0xff]   ;;  %v410_v47 = vld [vmem:[%s3912_s2 + $0x90] sm:$0xff]  ;;  %v412_v50 = vld [vmem:[%s3912_s2 + $0xa0] sm:$0xff] }
  0x35   : > { %v411_v48 = vld [vmem:[%s3912_s2 + $0x98] sm:$0xff]  ;;  %v413_v51 = vld [vmem:[%s3912_s2 + $0xa8] sm:$0xff]  ;;  %v2797_v52 = vld [vmem:[%s3911_s1 + $0x20] sm:$0xff]   ;;  %p2882_p5 = pnand %p2881_p4, %p2875_p1 }
  0x36   : > { %2684 = vmatpush1.bf16.msra.mxu1 %v326_v26  ;;  %v2802_v49 = vld [vmem:[%s3911_s1 + $0xd8] sm:$0xff]   ;;  %v414_v53 = vld [vmem:[%s3912_s2 + $0xb0] sm:$0xff]  ;;  %v2804_v55 = vld [vmem:[%s3911_s1 + $0xe0] sm:$0xff]  }
  0x37   : > { %488 = vperm.xlu0 %2790, %v398_v29   ;;  %2610 = vmatmul.mubr.msk.bf16.vlgmr.msra.gmra.mrb[0].mxu0 %vm936_vm0, %v2792_v28  ;;  %v415_v54 = vld [vmem:[%s3912_s2 + $0xb8] sm:$0xff]  ;;  %v416_v56 = vld [vmem:[%s3912_s2 + $0xc0] sm:$0xff]  ;;  %v417_v57 = vld [vmem:[%s3912_s2 + $0xc8] sm:$0xff] }
  0x38   : > { %493 = vperm.xlu1 %2791, %v399_v30   ;;  %1075 = vmatprep.mubr.bf16.mxu0 %v2936_v11  ;;  %v2799_v58 = vld [vmem:[%s3911_s1 + $0x28] sm:$0xff]   ;;  %v418_v59 = vld [vmem:[%s3912_s2 + $0xd0] sm:$0xff]  ;;  %v419_v60 = vld [vmem:[%s3912_s2 + $0xd8] sm:$0xff] }
  0x39   : > { %2634 = vmatmul.mubr.msk.bf16.vlgmr.msra.gmra.mrb[0].mxu1 %vm936_vm0, %v2796_v31  ;;  %v2806_v61 = vld [vmem:[%s3911_s1 + $0xe8] sm:$0xff]   ;;  %v420_v62 = vld [vmem:[%s3912_s2 + $0xe0] sm:$0xff]  ;;  %v2801_v0 = vld [vmem:[%s3911_s1 + $0x30] sm:$0xff]  }
  0x3a   : > { %1315 = vmatprep.mubr.bf16.mxu1 %v2936_v11  ;;  %v421_v63 = vld [vmem:[%s3912_s2 + $0xe8] sm:$0xff]  ;;  %v422_v1 = vld [vmem:[%s3912_s2 + $0xf0] sm:$0xff]  ;;  %v423_v2 = vld [vmem:[%s3912_s2 + $0xf8] sm:$0xff] }
  0x3b   : > { %498 = vperm.xlu0 %2790, %v400_v32   ;;  %v2808_v3 = vld [vmem:[%s3911_s1 + $0xf0] sm:$0xff]   ;;  %v424_v4 = vld [vmem:[%s3912_s2 + $0x100] sm:$0xff]  ;;  %v425_v5 = vld [vmem:[%s3912_s2 + $0x108] sm:$0xff] }
  0x3c   : > { %503 = vperm.xlu1 %2791, %v401_v33   ;;  %v426_v6 = vld [vmem:[%s3912_s2 + $0x110] sm:$0xff]  ;;  %v2803_v7 = vld [vmem:[%s3911_s1 + $0x38] sm:$0xff]   ;;  %v428_v10 = vld [vmem:[%s3912_s2 + $0x120] sm:$0xff] }
  0x3d   : > { %v427_v8 = vld [vmem:[%s3912_s2 + $0x118] sm:$0xff]  ;;  %v429_v12 = vld [vmem:[%s3912_s2 + $0x128] sm:$0xff]  ;;  %v2805_v13 = vld [vmem:[%s3911_s1 + $0x40] sm:$0xff]  }
  0x3e   : > { %v2810_v9 = vld [vmem:[%s3911_s1 + $0xf8] sm:$0xff]   ;;  %v430_v14 = vld [vmem:[%s3912_s2 + $0x130] sm:$0xff]  ;;  %v432_v16 = vld [vmem:[%s3912_s2 + $0x140] sm:$0xff] }
  0x3f   : > { %508 = vperm.xlu0 %2790, %v402_v35   ;;  %2611 = vmatmul.mubr.msk.bf16.gmra.mrb[4].mxu0 %vm936_vm0, %v2793_v34  ;;  %v431_v15 = vld [vmem:[%s3912_s2 + $0x138] sm:$0xff]  ;;  %v433_v17 = vld [vmem:[%s3912_s2 + $0x148] sm:$0xff]  ;;  %v434_v19 = vld [vmem:[%s3912_s2 + $0x150] sm:$0xff] }
  0x40   : > { %513 = vperm.xlu1 %2791, %v403_v36   ;;  %1085 = vmatprep.mubr.bf16.mxu0 %v2936_v11  ;;  %v2807_v18 = vld [vmem:[%s3911_s1 + $0x48] sm:$0xff]   ;;  %v435_v20 = vld [vmem:[%s3912_s2 + $0x158] sm:$0xff]  ;;  %v436_v21 = vld [vmem:[%s3912_s2 + $0x160] sm:$0xff] }
  0x41   : > { %2635 = vmatmul.mubr.msk.bf16.gmra.mrb[4].mxu1 %vm936_vm0, %v2798_v37  ;;  %v437_v22 = vld [vmem:[%s3912_s2 + $0x168] sm:$0xff]  ;;  %v2809_v23 = vld [vmem:[%s3911_s1 + $0x50] sm:$0xff]   ;;  %v439_v25 = vld [vmem:[%s3912_s2 + $0x178] sm:$0xff] }
  0x42   : > { %1325 = vmatprep.mubr.bf16.mxu1 %v2936_v11  ;;  %v438_v24 = vld [vmem:[%s3912_s2 + $0x170] sm:$0xff]  ;;  %v440_v26 = vld [vmem:[%s3912_s2 + $0x180] sm:$0xff]  ;;  %v441_v27 = vld [vmem:[%s3912_s2 + $0x188] sm:$0xff] }
  0x43   : > { %518 = vperm.xlu0 %2790, %v404_v38   ;;  %v2811_v28 = vld [vmem:[%s3911_s1 + $0x58] sm:$0xff]   ;;  %v442_v29 = vld [vmem:[%s3912_s2 + $0x190] sm:$0xff]  ;;  %v444_v31 = vld [vmem:[%s3912_s2 + $0x1a0] sm:$0xff] }
  0x44   : > { %523 = vperm.xlu1 %2791, %v405_v39   ;;  %v443_v30 = vld [vmem:[%s3912_s2 + $0x198] sm:$0xff]  ;;  %v445_v32 = vld [vmem:[%s3912_s2 + $0x1a8] sm:$0xff]  ;;  %v2812_v33 = vld [vmem:[%s3911_s1 + $0x60] sm:$0xff]  }
  0x45   : > { %v446_v34 = vld [vmem:[%s3912_s2 + $0x1b0] sm:$0xff]  ;;  %v447_v35 = vld [vmem:[%s3912_s2 + $0x1b8] sm:$0xff]  ;;  %v448_v36 = vld [vmem:[%s3912_s2 + $0x1c0] sm:$0xff] }
  0x46   : > { %v449_v37 = vld [vmem:[%s3912_s2 + $0x1c8] sm:$0xff]  ;;  %v450_v39 = vld [vmem:[%s3912_s2 + $0x1d0] sm:$0xff] }
  0x47   : > { %528 = vperm.xlu0 %2790, %v406_v41   ;;  %2612 = vmatmul.mubr.msk.bf16.gmra.mrb[8].mxu0 %vm936_vm0, %v2794_v40  ;;  %v2813_v38 = vld [vmem:[%s3911_s1 + $0x68] sm:$0xff]   ;;  %v451_v40 = vld [vmem:[%s3912_s2 + $0x1d8] sm:$0xff]  ;;  %v452_v41 = vld [vmem:[%s3912_s2 + $0x1e0] sm:$0xff] }
  0x48   : > { %533 = vperm.xlu1 %2791, %v407_v42   ;;  %1095 = vmatprep.mubr.bf16.mxu0 %v2936_v11  ;;  %v453_v42 = vld [vmem:[%s3912_s2 + $0x1e8] sm:$0xff] }
  0x49   : > { %2636 = vmatmul.mubr.msk.bf16.gmra.mrb[8].mxu1 %vm936_vm0, %v2800_v43  ;;  %v2814_v43 = vld [vmem:[%s3911_s1 + $0x70] sm:$0xff]  }
  0x4a   : > { %1335 = vmatprep.mubr.bf16.mxu1 %v2936_v11 }
  0x4b   : > { %538 = vperm.xlu0 %2790, %v408_v44   ;;  %v454_v44 = vld [vmem:[%s3912_s2 + $0x1f0] sm:$0xff] }
  0x4c   : > { %543 = vperm.xlu1 %2791, %v409_v45   ;;  %v455_v45 = vld [vmem:[%s3912_s2 + $0x1f8] sm:$0xff] }
  0x4f   : > { %548 = vperm.xlu0 %2790, %v410_v47   ;;  %2613 = vmatmul.mubr.msk.bf16.gmra.mrb[12].mxu0 %vm936_vm0, %v2795_v46  ;;  %v1738_v46 = vld [vmem:[%s3914_s4] sm:$0xff]  ;;  %v1739_v47 = vld [vmem:[%s3914_s4 + $0x8] sm:$0xff] }
  0x50   : > { %553 = vperm.xlu1 %2791, %v411_v48   ;;  %1105 = vmatprep.mubr.bf16.mxu0 %v2936_v11 }
  0x51   : > { %2637 = vmatmul.mubr.msk.bf16.gmra.mrb[12].mxu1 %vm936_vm0, %v2802_v49 }
  0x52   : > { %1345 = vmatprep.mubr.bf16.mxu1 %v2936_v11 }
  0x53   : > { %558 = vperm.xlu0 %2790, %v412_v50   ;;  %v2815_v50 = vld [vmem:[%s3911_s1 + $0x78] sm:$0xff]  }
  0x54   : > { %563 = vperm.xlu1 %2791, %v413_v51   ;;  %v1740_v51 = vld [vmem:[%s3914_s4 + $0x10] sm:$0xff] }
  0x57   : > { %568 = vperm.xlu0 %2790, %v414_v53   ;;  %2614 = vmatmul.mubr.msk.bf16.gmra.mrb[16].mxu0 %vm936_vm0, %v2797_v52  ;;  %v1741_v52 = vld [vmem:[%s3914_s4 + $0x18] sm:$0xff] }
  0x58   : > { %573 = vperm.xlu1 %2791, %v415_v54   ;;  %1115 = vmatprep.mubr.bf16.mxu0 %v2936_v11 }
  0x59   : > { %2638 = vmatmul.mubr.msk.bf16.gmra.mrb[16].mxu1 %vm936_vm0, %v2804_v55  ;;  %v1742_v55 = vld [vmem:[%s3914_s4 + $0x20] sm:$0xff] }
  0x5a   : > { %1355 = vmatprep.mubr.bf16.mxu1 %v2936_v11 }
  0x5b   : > { %578 = vperm.xlu0 %2790, %v416_v56   ;;  %v2284_v56 = vld [vmem:[%s3915_s5] sm:$0xff] }
  0x5c   : > { %583 = vperm.xlu1 %2791, %v417_v57  }
  0x5f   : > { %588 = vperm.xlu0 %2790, %v418_v59   ;;  %2615 = vmatmul.mubr.msk.bf16.gmra.mrb[20].mxu0 %vm936_vm0, %v2799_v58  ;;  %v2816_v59 = vld [vmem:[%s3911_s1 + $0x80] sm:$0xff]  }
  0x60   : > { %593 = vperm.xlu1 %2791, %v419_v60   ;;  %1125 = vmatprep.mubr.bf16.mxu0 %v2936_v11  ;;  %v2285_v60 = vld [vmem:[%s3915_s5 + $0x8] sm:$0xff] }
  0x61   : > { %2639 = vmatmul.mubr.msk.bf16.gmra.mrb[20].mxu1 %vm936_vm0, %v2806_v61  ;;  %v1743_v61 = vld [vmem:[%s3914_s4 + $0x28] sm:$0xff] }
  0x62   : > { %1365 = vmatprep.mubr.bf16.mxu1 %v2936_v11 }
  0x63   : > { %598 = vperm.xlu0 %2790, %v420_v62  }
  0x64   : > { %603 = vperm.xlu1 %2791, %v421_v63  }
  0x67   : > { %608 = vperm.xlu0 %2790, %v422_v1   ;;  %2616 = vmatmul.mubr.msk.bf16.gmra.mrb[24].mxu0 %vm936_vm0, %v2801_v0  ;;  %v2286_v0 = vld [vmem:[%s3915_s5 + $0x10] sm:$0xff] }
  0x68   : > { %613 = vperm.xlu1 %2791, %v423_v2   ;;  %1135 = vmatprep.mubr.bf16.mxu0 %v2936_v11  ;;  %v1744_v1 = vld [vmem:[%s3914_s4 + $0x30] sm:$0xff] }
  0x69   : > { %2640 = vmatmul.mubr.msk.bf16.gmra.mrb[24].mxu1 %vm936_vm0, %v2808_v3 }
  0x6a   : > { %1375 = vmatprep.mubr.bf16.mxu1 %v2936_v11 }
  0x6b   : > { %618 = vperm.xlu0 %2790, %v424_v4   ;;  %v2817_v4 = vld [vmem:[%s3911_s1 + $0x88] sm:$0xff]  }
  0x6c   : > { %623 = vperm.xlu1 %2791, %v425_v5   ;;  %v2287_v5 = vld [vmem:[%s3915_s5 + $0x18] sm:$0xff] }
  0x6f   : > { %628 = vperm.xlu0 %2790, %v426_v6   ;;  %2617 = vmatmul.mubr.msk.bf16.gmra.mrb[28].mxu0 %vm936_vm0, %v2803_v7  ;;  %v1745_v6 = vld [vmem:[%s3914_s4 + $0x38] sm:$0xff] }
  0x70   : > { %633 = vperm.xlu1 %2791, %v427_v8   ;;  %1145 = vmatprep.mubr.bf16.mxu0 %v2936_v11 }
  0x71   : > { %2641 = vmatmul.mubr.msk.bf16.gmra.mrb[28].mxu1 %vm936_vm0, %v2810_v9  ;;  %v2288_v9 = vld [vmem:[%s3915_s5 + $0x20] sm:$0xff] }
  0x73   : > { %638 = vperm.xlu0 %2790, %v428_v10   ;;  %v1746_v10 = vld [vmem:[%s3914_s4 + $0x40] sm:$0xff] }
  0x74   : > { %643 = vperm.xlu1 %2791, %v429_v12  }
  0x77   : > { %648 = vperm.xlu0 %2790, %v430_v14   ;;  %2618 = vmatmul.mubr.msk.bf16.gmra.mrb[32].mxu0 %vm936_vm0, %v2805_v13  ;;  %v2818_v14 = vld [vmem:[%s3911_s1 + $0x90] sm:$0xff]  }
  0x78   : > { %653 = vperm.xlu1 %2791, %v431_v15   ;;  %1155 = vmatprep.mubr.bf16.mxu0 %v2936_v11  ;;  %v2289_v15 = vld [vmem:[%s3915_s5 + $0x28] sm:$0xff] }
  0x7b   : > { %658 = vperm.xlu0 %2790, %v432_v16   ;;  %v1747_v16 = vld [vmem:[%s3914_s4 + $0x48] sm:$0xff] }
  0x7c   : > { %663 = vperm.xlu1 %2791, %v433_v17  }
  0x7f   : > { %668 = vperm.xlu0 %2790, %v434_v19   ;;  %2619 = vmatmul.mubr.msk.bf16.gmra.mrb[36].mxu0 %vm936_vm0, %v2807_v18  ;;  %v2290_v19 = vld [vmem:[%s3915_s5 + $0x30] sm:$0xff] }
  0x80   : > { %673 = vperm.xlu1 %2791, %v435_v20   ;;  %1165 = vmatprep.mubr.bf16.mxu0 %v2936_v11  ;;  %v1748_v20 = vld [vmem:[%s3914_s4 + $0x50] sm:$0xff] }
  0x83   : > { %678 = vperm.xlu0 %2790, %v436_v21  }
  0x84   : > { %683 = vperm.xlu1 %2791, %v437_v22  }
  0x87   : > { %688 = vperm.xlu0 %2790, %v438_v24   ;;  %2620 = vmatmul.mubr.msk.bf16.gmra.mrb[40].mxu0 %vm936_vm0, %v2809_v23  ;;  %v2819_v23 = vld [vmem:[%s3911_s1 + $0x98] sm:$0xff]  }
  0x88   : > { %693 = vperm.xlu1 %2791, %v439_v25   ;;  %1175 = vmatprep.mubr.bf16.mxu0 %v2936_v11  ;;  %v2291_v24 = vld [vmem:[%s3915_s5 + $0x38] sm:$0xff] }
  0x89   : > { %v1749_v25 = vld [vmem:[%s3914_s4 + $0x58] sm:$0xff] }
  0x8b   : > { %698 = vperm.xlu0 %2790, %v440_v26  }
  0x8c   : > { %703 = vperm.xlu1 %2791, %v441_v27  }
  0x8f   : > { %708 = vperm.xlu0 %2790, %v442_v29   ;;  %2621 = vmatmul.mubr.msk.bf16.gmra.mrb[44].mxu0 %vm936_vm0, %v2811_v28  ;;  %v2292_v28 = vld [vmem:[%s3915_s5 + $0x40] sm:$0xff] }
  0x90   : > { %713 = vperm.xlu1 %2791, %v443_v30   ;;  %1185 = vmatprep.mubr.bf16.mxu0 %v2936_v11  ;;  %v1750_v29 = vld [vmem:[%s3914_s4 + $0x60] sm:$0xff] }
  0x93   : > { %718 = vperm.xlu0 %2790, %v444_v31  }
  0x94   : > { %723 = vperm.xlu1 %2791, %v445_v32   ;;  %v2820_v32 = vld [vmem:[%s3911_s1 + $0xa0] sm:$0xff]  }
  0x97   : > { %728 = vperm.xlu0 %2790, %v446_v34   ;;  %2622 = vmatmul.mubr.msk.bf16.gmra.mrb[48].mxu0 %vm936_vm0, %v2812_v33  ;;  %v2293_v33 = vld [vmem:[%s3915_s5 + $0x48] sm:$0xff] }
  0x98   : > { %733 = vperm.xlu1 %2791, %v447_v35   ;;  %1195 = vmatprep.mubr.bf16.mxu0 %v2936_v11  ;;  %v1751_v34 = vld [vmem:[%s3914_s4 + $0x68] sm:$0xff] }
  0x9b   : > { %738 = vperm.xlu0 %2790, %v448_v36  }
  0x9c   : > { %743 = vperm.xlu1 %2791, %v449_v37   ;;  %v2294_v37 = vld [vmem:[%s3915_s5 + $0x50] sm:$0xff] }
  0x9f   : > { %748 = vperm.xlu0 %2790, %v450_v39   ;;  %2623 = vmatmul.mubr.msk.bf16.gmra.mrb[52].mxu0 %vm936_vm0, %v2813_v38  ;;  %v1752_v38 = vld [vmem:[%s3914_s4 + $0x70] sm:$0xff] }
  0xa0   : > { %753 = vperm.xlu1 %2791, %v451_v40   ;;  %1205 = vmatprep.mubr.bf16.mxu0 %v2936_v11 }
  0xa3   : > { %758 = vperm.xlu0 %2790, %v452_v41   ;;  %v2821_v41 = vld [vmem:[%s3911_s1 + $0xa8] sm:$0xff]  }
  0xa4   : > { %763 = vperm.xlu1 %2791, %v453_v42   ;;  %v2295_v42 = vld [vmem:[%s3915_s5 + $0x58] sm:$0xff] }
  0xa7   : > { %768 = vperm.xlu0 %2790, %v454_v44   ;;  %2624 = vmatmul.mubr.msk.bf16.gmra.mrb[56].mxu0 %vm936_vm0, %v2814_v43  ;;  %v1753_v43 = vld [vmem:[%s3914_s4 + $0x78] sm:$0xff] }
  0xa8   : > { %773 = vperm.xlu1 %2791, %v455_v45   ;;  %1215 = vmatprep.mubr.bf16.mxu0 %v2936_v11 }
  0xaa   : > { %v3358_v48 = vpop.permute.xlu0 %458  ;;  %v3360_v49 = vpop.permute.xlu1 %468 }
  0xab   : > { %1756 = vperm.xlu0 %2790, %v1738_v46   ;;  %v2296_v46 = vld [vmem:[%s3915_s5 + $0x60] sm:$0xff] }
  0xac   : > { %1761 = vperm.xlu1 %2791, %v1739_v47   ;;  %v2297_v47 = vld [vmem:[%s3915_s5 + $0x68] sm:$0xff] }
  0xae   : > { %v3371_v53 = vpop.permute.xlu0 %463 }
  0xaf   : > { %1766 = vperm.xlu0 %2790, %v1740_v51   ;;  %2625 = vmatmul.mubr.msk.bf16.gmra.mrb[60].mxu0 %vm936_vm0, %v2815_v50  ;;  %v3374_v54 = vpop.permute.xlu1 %473 }
  0xb0   : > { %1771 = vperm.xlu1 %2791, %v1741_v52   ;;  %1225 = vmatprep.mubr.bf16.mxu0 %v2936_v11  ;;  %v2822_v52 = vld [vmem:[%s3911_s1 + $0xb0] sm:$0xff]  }
  0xb2   : > { %v3383_v57 = vpop.permute.xlu0 %478 }
  0xb3   : > { %1776 = vperm.xlu0 %2790, %v1742_v55   ;;  %v3385_v58 = vpop.permute.xlu1 %483  ;;  %v2298_v55 = vld [vmem:[%s3915_s5 + $0x70] sm:$0xff] }
  0xb4   : > { %2302 = vperm.xlu1 %2791, %v2284_v56   ;;  %v2299_v56 = vld [vmem:[%s3915_s5 + $0x78] sm:$0xff] }
  0xb6   : > { %v3396_v62 = vpop.permute.xlu0 %488 }
  0xb7   : > { %2307 = vperm.xlu0 %2790, %v2285_v60   ;;  %2626 = vmatmul.mubr.msk.bf16.gmra.mrb[64].mxu0 %vm936_vm0, %v2816_v59  ;;  %v3399_v63 = vpop.permute.xlu1 %493 }
  0xb8   : > { %1781 = vperm.xlu1 %2791, %v1743_v61   ;;  %1235 = vmatprep.mubr.bf16.mxu0 %v2936_v11  ;;  %v2454_v61 = vld [vmem:[#allocation2] sm:$0x1] }
  0xba   : > { %v3408_v2 = vpop.permute.xlu0 %498 }
  0xbb   : > { %2312 = vperm.xlu0 %2790, %v2286_v0   ;;  %v3410_v3 = vpop.permute.xlu1 %503 }
  0xbc   : > { %1786 = vperm.xlu1 %2791, %v1744_v1  }
  0xbe   : > { %v3421_v7 = vpop.permute.xlu0 %508 }
  0xbf   : > { %2317 = vperm.xlu0 %2790, %v2287_v5   ;;  %2627 = vmatmul.mubr.msk.bf16.gmra.mrb[68].mxu0 %vm936_vm0, %v2817_v4  ;;  %v3424_v8 = vpop.permute.xlu1 %513  ;;  %v2823_v4 = vld [vmem:[%s3911_s1 + $0xb8] sm:$0xff]  }
  0xc0   : > { %1791 = vperm.xlu1 %2791, %v1745_v6   ;;  %1245 = vmatprep.mubr.bf16.mxu0 %v2936_v11 }
  0xc2   : > { %v3433_v12 = vpop.permute.xlu0 %518 }
  0xc3   : > { %2322 = vperm.xlu0 %2790, %v2288_v9   ;;  %v3435_v13 = vpop.permute.xlu1 %523 }
  0xc4   : > { %1796 = vperm.xlu1 %2791, %v1746_v10  }
  0xc6   : > { %v3446_v17 = vpop.permute.xlu0 %528 }
  0xc7   : > { %2327 = vperm.xlu0 %2790, %v2289_v15   ;;  %2628 = vmatmul.mubr.msk.bf16.gmra.mrb[72].mxu0 %vm936_vm0, %v2818_v14  ;;  %v3449_v18 = vpop.permute.xlu1 %533 }
  0xc8   : > { %1801 = vperm.xlu1 %2791, %v1747_v16   ;;  %1255 = vmatprep.mubr.bf16.mxu0 %v2936_v11 }
  0xca   : > { %v3458_v21 = vpop.permute.xlu0 %538 }
  0xcb   : > { %2332 = vperm.xlu0 %2790, %v2290_v19   ;;  %v3460_v22 = vpop.permute.xlu1 %543 }
  0xcc   : > { %1806 = vperm.xlu1 %2791, %v1748_v20  }
  0xce   : > { %v3471_v26 = vpop.permute.xlu0 %548 }
  0xcf   : > { %2337 = vperm.xlu0 %2790, %v2291_v24   ;;  %2629 = vmatmul.mubr.msk.bf16.gmra.mrb[76].mxu0 %vm936_vm0, %v2819_v23  ;;  %v3474_v27 = vpop.permute.xlu1 %553 }
  0xd0   : > { %1811 = vperm.xlu1 %2791, %v1749_v25   ;;  %1265 = vmatprep.mubr.bf16.mxu0 %v2936_v11 }
  0xd2   : > { %v3483_v30 = vpop.permute.xlu0 %558 }
  0xd3   : > { %2342 = vperm.xlu0 %2790, %v2292_v28   ;;  %v3485_v31 = vpop.permute.xlu1 %563 }
  0xd4   : > { %1816 = vperm.xlu1 %2791, %v1750_v29  }
  0xd6   : > { %v3496_v35 = vpop.permute.xlu0 %568 }
  0xd7   : > { %2347 = vperm.xlu0 %2790, %v2293_v33   ;;  %2630 = vmatmul.mubr.msk.bf16.gmra.mrb[80].mxu0 %vm936_vm0, %v2820_v32  ;;  %v3499_v36 = vpop.permute.xlu1 %573 }
  0xd8   : > { %1821 = vperm.xlu1 %2791, %v1751_v34   ;;  %1275 = vmatprep.mubr.bf16.mxu0 %v2936_v11 }
  0xda   : > { %v3508_v39 = vpop.permute.xlu0 %578 }
  0xdb   : > { %2352 = vperm.xlu0 %2790, %v2294_v37   ;;  %v3510_v40 = vpop.permute.xlu1 %583 }
  0xdc   : > { %1826 = vperm.xlu1 %2791, %v1752_v38  }
  0xde   : > { %v3521_v44 = vpop.permute.xlu0 %588 }
  0xdf   : > { %2357 = vperm.xlu0 %2790, %v2295_v42   ;;  %2631 = vmatmul.mubr.msk.bf16.gmra.mrb[84].mxu0 %vm936_vm0, %v2821_v41  ;;  %v3524_v45 = vpop.permute.xlu1 %593 }
  0xe0   : > { %1831 = vperm.xlu1 %2791, %v1753_v43   ;;  %1285 = vmatprep.mubr.bf16.mxu0 %v2936_v11 }
  0xe2   : > { %v3533_v50 = vpop.permute.xlu0 %598 }
  0xe3   : > { %2362 = vperm.xlu0 %2790, %v2296_v46   ;;  %v3535_v51 = vpop.permute.xlu1 %603 }
  0xe4   : > { %2367 = vperm.xlu1 %2791, %v2297_v47  }
  0xe6   : > { %v3546_v59 = vpop.permute.xlu0 %608 }
  0xe7   : > { %2372 = vperm.xlu0 %2790, %v2298_v55   ;;  %2632 = vmatmul.mubr.msk.bf16.gmra.mrb[88].mxu0 %vm936_vm0, %v2822_v52  ;;  %v3549_v60 = vpop.permute.xlu1 %613 }
  0xe8   : > { %2377 = vperm.xlu1 %2791, %v2299_v56   ;;  %1295 = vmatprep.mubr.bf16.mxu0 %v2936_v11 }
  0xea   : > { %v3552_v0 = vpop.permute.xlu0 %618 }
  0xeb   : > { %2457 = vperm.xlu0 %2790, %v2454_v61   ;;  %v3554_v1 = vpop.permute.xlu1 %623 }
  0xec   : > { %3935 = vst [vmem:[#allocation7_spill] sm:$0xff] %v3554_v1 }
  0xee   : > { %v3559_v5 = vpop.permute.xlu0 %628 }
  0xef   : > { %3936 = vst [vmem:[#allocation8_spill] sm:$0xff] %v3559_v5  ;;  %2633 = vmatmul.mubr.msk.bf16.gmra.mrb[92].mxu0 %vm936_vm0, %v2823_v4  ;;  %v3562_v6 = vpop.permute.xlu1 %633 }
  0xf0   : > { %3937 = vst [vmem:[#allocation9_spill] sm:$0xff] %v3562_v6 }
  0xf2   : > { %v3564_v9 = vpop.permute.xlu0 %638 }
  0xf3   : > { %3938 = vst [vmem:[#allocation10_spill] sm:$0xff] %v3564_v9  ;;  %v3566_v10 = vpop.permute.xlu1 %643 }
  0xf4   : > { %3939 = vst [vmem:[#allocation11_spill] sm:$0xff] %v3566_v10 }
  0xf6   : > { %v3568_v11 = vpop.permute.xlu0 %648 }
  0xf7   : > { %3940 = vst [vmem:[#allocation12_spill] sm:$0xff] %v3568_v11  ;;  %v3570_v14 = vpop.permute.xlu1 %653 }
  0xf8   : > { %3941 = vst [vmem:[#allocation13_spill] sm:$0xff] %v3570_v14 }
  0xfa   : > { %v3572_v15 = vpop.permute.xlu0 %658 }
  0xfb   : > { %3942 = vst [vmem:[#allocation14_spill] sm:$0xff] %v3572_v15  ;;  %v3574_v16 = vpop.permute.xlu1 %663 }
  0xfc   : > { %3943 = vst [vmem:[#allocation15_spill] sm:$0xff] %v3574_v16 }
  0xfe   : > { %v3576_v19 = vpop.permute.xlu0 %668 }
  0xff   : > { %3944 = vst [vmem:[#allocation16_spill] sm:$0xff] %v3576_v19  ;;  %v3578_v20 = vpop.permute.xlu1 %673 }
 0x100   : > { %3945 = vst [vmem:[#allocation17_spill] sm:$0xff] %v3578_v20 }
 0x102   : > { %v3580_v23 = vpop.permute.xlu0 %678 }
 0x103   : > { %3946 = vst [vmem:[#allocation18_spill] sm:$0xff] %v3580_v23  ;;  %v3582_v24 = vpop.permute.xlu1 %683 }
 0x104   : > { %3947 = vst [vmem:[#allocation19_spill] sm:$0xff] %v3582_v24 }
 0x106   : > { %v3584_v25 = vpop.permute.xlu0 %688 }
 0x107   : > { %3948 = vst [vmem:[#allocation20_spill] sm:$0xff] %v3584_v25  ;;  %v3586_v28 = vpop.permute.xlu1 %693 }
 0x108   : > { %3949 = vst [vmem:[#allocation21_spill] sm:$0xff] %v3586_v28 }
 0x10a   : > { %v1067_v29 = vpop.f32.mrb[0].mxu0  ;;  %v699_v32 = vpop.permute.xlu0 %698 }
 0x10b   : > { %v1068_v33 = vadd.f32 %v1067_v29, %v3358_v48  ;;  %v1069_v34 = vpop.f32.mrb[1].mxu0  ;;  %v704_v56 = vpop.permute.xlu1 %703 }
 0x10c   : > { %v1070_v37 = vadd.f32 %v1069_v34, %v3358_v48  ;;  %v1071_v38 = vpop.f32.mrb[2].mxu0  ;;  %v1307_v41 = vpop.f32.mrb[0].mxu1 }
 0x10d   : > { %v1386_v42 = vmul.f32 0.2, %v1068_v33  ;;  %v1072_v43 = vadd.f32 %v1071_v38, %v3371_v53  ;;  %v1073_v46 = vpop.f32.mrb[3].mxu0  ;;  %v1308_v47 = vadd.f32 %v1307_v41, %v699_v32  ;;  %v1309_v52 = vpop.f32.mrb[1].mxu1 }
 0x10e   : > { %v1387_v55 = vmul.f32 0.2, %v1070_v37  ;;  %v1074_v61 = vadd.f32 %v1073_v46, %v3371_v53  ;;  %v1310_v4 = vadd.f32 %v1309_v52, %v699_v32  ;;  %v1311_v28 = vpop.f32.mrb[2].mxu1  ;;  %v709_v53 = vpop.permute.xlu0 %708 }
 0x10f   : > { %v1388_v25 = vmul.f32 0.2, %v1072_v43  ;;  %v1482_v24 = vmul.f32 0.2, %v1308_v47  ;;  %v1312_v29 = vadd.f32 %v1311_v28, %v704_v56  ;;  %v1313_v23 = vpop.f32.mrb[3].mxu1  ;;  %v1514_v19 = vmax.f32 %v1068_v33, %v1386_v42  ;;  %v714_v42 = vpop.permute.xlu1 %713 }
 0x110   : > { %v1389_v20 = vmul.f32 0.2, %v1074_v61  ;;  %v1483_v48 = vmul.f32 0.2, %v1310_v4  ;;  %v1314_v34 = vadd.f32 %v1313_v23, %v704_v56  ;;  %v1515_v14 = vmax.f32 %v1070_v37, %v1387_v55 }
 0x111   : > { %v1516_v16 = vmax.f32 %v1072_v43, %v1388_v25  ;;  %v1610_v15 = vmax.f32 %v1308_v47, %v1482_v24  ;;  %v1484_v38 = vmul.f32 0.2, %v1312_v29  ;;  %v2826_v24 = vld [vmem:[%s3913_s3 + $0x4] ss:$16 sps:$4 sm:$0xff]  }
 0x112   : > { %v1517_v41 = vmax.f32 %v1074_v61, %v1389_v20  ;;  %v1077_v11 = vpop.f32.mrb[4].mxu0  ;;  %v1611_v10 = vmax.f32 %v1310_v4, %v1483_v48  ;;  %v1485_v9 = vmul.f32 0.2, %v1314_v34  ;;  %2026 = vmatprep.mubr.bf16.mxu1 %v2826_v24 }
 0x113   : > { %v1674_v6 = vpack.c.bf16 %v1516_v16, %v1514_v19  ;;  %v1078_v32 = vadd.f32 %v1077_v11, %v3360_v49  ;;  %v1079_v46 = vpop.f32.mrb[5].mxu0  ;;  %v1612_v52 = vmax.f32 %v1312_v29, %v1484_v38 }
 0x114   : > { %v1080_v28 = vadd.f32 %v1079_v46, %v3360_v49  ;;  %v1081_v5 = vpop.f32.mrb[6].mxu0  ;;  %v1675_v1 = vpack.c.bf16 %v1517_v41, %v1515_v14  ;;  %v1613_v23 = vmax.f32 %v1314_v34, %v1485_v9  ;;  %v1317_v33 = vpop.f32.mrb[4].mxu1 }
 0x115   : > { %v1390_v20 = vmul.f32 0.2, %v1078_v32  ;;  %v1082_v25 = vadd.f32 %v1081_v5, %v3374_v54  ;;  %v1083_v37 = vpop.f32.mrb[7].mxu0  ;;  %v3598_v16 = vpack.c.bf16 %v1612_v52, %v1610_v15  ;;  %v1318_v19 = vadd.f32 %v1317_v33, %v709_v53  ;;  %v1319_v11 = vpop.f32.mrb[5].mxu1 }
 0x116   : > { %v1391_v43 = vmul.f32 0.2, %v1080_v28  ;;  %v1084_v49 = vadd.f32 %v1083_v37, %v3374_v54  ;;  %1994 = vmatprep.subr.bf16.mxu1 %v1675_v1  ;;  %v1320_v14 = vadd.f32 %v1319_v11, %v709_v53  ;;  %v1321_v9 = vpop.f32.mrb[6].mxu1  ;;  %v3601_v47 = vpack.c.bf16 %v1613_v23, %v1611_v10  ;;  %v719_v33 = vpop.permute.xlu0 %718 }
 0x117   : > { %v1392_v55 = vmul.f32 0.2, %v1082_v25  ;;  %1995 = vmatpush1.bf16.msra.mxu1 %v1674_v6  ;;  %v1486_v56 = vmul.f32 0.2, %v1318_v19  ;;  %v1322_v61 = vadd.f32 %v1321_v9, %v714_v42  ;;  %v1323_v5 = vpop.f32.mrb[7].mxu1  ;;  %v1518_v48 = vmax.f32 %v1078_v32, %v1390_v20 }
 0x118   : > { %v1393_v4 = vmul.f32 0.2, %v1084_v49  ;;  %v1487_v15 = vmul.f32 0.2, %v1320_v14  ;;  %v1324_v29 = vadd.f32 %v1323_v5, %v714_v42  ;;  %v1519_v46 = vmax.f32 %v1080_v28, %v1391_v43 }
 0x119   : > { %v1520_v34 = vmax.f32 %v1082_v25, %v1392_v55  ;;  %v1614_v38 = vmax.f32 %v1318_v19, %v1486_v56  ;;  %v1488_v41 = vmul.f32 0.2, %v1322_v61 }
 0x11a   : > { %v1521_v54 = vmax.f32 %v1084_v49, %v1393_v4  ;;  %v1087_v1 = vpop.f32.mrb[8].mxu0  ;;  %v1615_v53 = vmax.f32 %v1320_v14, %v1487_v15  ;;  %v1489_v52 = vmul.f32 0.2, %v1324_v29  ;;  %v724_v14 = vpop.permute.xlu1 %723 }
 0x11b   : > { %v1676_v10 = vpack.c.bf16 %v1520_v34, %v1518_v48  ;;  %v1088_v23 = vadd.f32 %v1087_v1, %v3383_v57  ;;  %v1089_v6 = vpop.f32.mrb[9].mxu0  ;;  %v1616_v24 = vmax.f32 %v1322_v61, %v1488_v41 }
 0x11c   : > { %v1090_v37 = vadd.f32 %v1089_v6, %v3383_v57  ;;  %v1091_v11 = vpop.f32.mrb[10].mxu0  ;;  %v1677_v9 = vpack.c.bf16 %v1521_v54, %v1519_v46  ;;  %v1617_v42 = vmax.f32 %v1324_v29, %v1489_v52  ;;  %v1327_v32 = vpop.f32.mrb[8].mxu1 }
 0x11d   : > { %v1394_v20 = vmul.f32 0.2, %v1088_v23  ;;  %v1092_v25 = vadd.f32 %v1091_v11, %v3385_v58  ;;  %v1093_v28 = vpop.f32.mrb[11].mxu0  ;;  %v3606_v19 = vpack.c.bf16 %v1616_v24, %v1614_v38  ;;  %v1328_v43 = vadd.f32 %v1327_v32, %v719_v33  ;;  %v1329_v49 = vpop.f32.mrb[9].mxu1 }
 0x11e   : > { %v1395_v55 = vmul.f32 0.2, %v1090_v37  ;;  %v1094_v56 = vadd.f32 %v1093_v28, %v3385_v58  ;;  %1996 = vmatprep.subr.bf16.mxu1 %v1677_v9  ;;  %v1330_v61 = vadd.f32 %v1329_v49, %v719_v33  ;;  %v1331_v5 = vpop.f32.mrb[10].mxu1  ;;  %v3609_v57 = vpack.c.bf16 %v1617_v42, %v1615_v53  ;;  %v729_v9 = vpop.permute.xlu0 %728 }
 0x11f   : > { %v1396_v4 = vmul.f32 0.2, %v1092_v25  ;;  %1997 = vmatpush1.bf16.msra.mxu1 %v1676_v10  ;;  %v1490_v15 = vmul.f32 0.2, %v1328_v43  ;;  %v1332_v29 = vadd.f32 %v1331_v5, %v724_v14  ;;  %v1333_v48 = vpop.f32.mrb[11].mxu1  ;;  %v1522_v46 = vmax.f32 %v1088_v23, %v1394_v20 }
 0x120   : > { %v1397_v34 = vmul.f32 0.2, %v1094_v56  ;;  %v1491_v41 = vmul.f32 0.2, %v1330_v61  ;;  %v1334_v38 = vadd.f32 %v1333_v48, %v724_v14  ;;  %v1523_v6 = vmax.f32 %v1090_v37, %v1395_v55 }
 0x121   : > { %v1524_v54 = vmax.f32 %v1092_v25, %v1396_v4  ;;  %v1618_v1 = vmax.f32 %v1328_v43, %v1490_v15  ;;  %v1492_v52 = vmul.f32 0.2, %v1332_v29 }
 0x122   : > { %v1525_v24 = vmax.f32 %v1094_v56, %v1397_v34  ;;  %v1097_v58 = vpop.f32.mrb[12].mxu0  ;;  %v1619_v11 = vmax.f32 %v1330_v61, %v1491_v41  ;;  %v1493_v33 = vmul.f32 0.2, %v1334_v38  ;;  %v734_v61 = vpop.permute.xlu1 %733 }
 0x123   : > { %v1678_v53 = vpack.c.bf16 %v1524_v54, %v1522_v46  ;;  %v1098_v42 = vadd.f32 %v1097_v58, %v3396_v62  ;;  %v1099_v10 = vpop.f32.mrb[13].mxu0  ;;  %v1620_v32 = vmax.f32 %v1332_v29, %v1492_v52 }
 0x124   : > { %v1100_v28 = vadd.f32 %v1099_v10, %v3396_v62  ;;  %v1101_v49 = vpop.f32.mrb[14].mxu0  ;;  %v1679_v5 = vpack.c.bf16 %v1525_v24, %v1523_v6  ;;  %v1621_v14 = vmax.f32 %v1334_v38, %v1493_v33  ;;  %v1337_v23 = vpop.f32.mrb[12].mxu1 }
 0x125   : > { %v1398_v20 = vmul.f32 0.2, %v1098_v42  ;;  %v1102_v25 = vadd.f32 %v1101_v49, %v3399_v63  ;;  %v1103_v37 = vpop.f32.mrb[15].mxu0  ;;  %v3614_v43 = vpack.c.bf16 %v1620_v32, %v1618_v1  ;;  %v1338_v55 = vadd.f32 %v1337_v23, %v729_v9  ;;  %v1339_v56 = vpop.f32.mrb[13].mxu1 }
 0x126   : > { %v1399_v4 = vmul.f32 0.2, %v1100_v28  ;;  %v1104_v15 = vadd.f32 %v1103_v37, %v3399_v63  ;;  %1998 = vmatprep.subr.bf16.mxu1 %v1679_v5  ;;  %v1340_v29 = vadd.f32 %v1339_v56, %v729_v9  ;;  %v1341_v48 = vpop.f32.mrb[14].mxu1  ;;  %v3617_v62 = vpack.c.bf16 %v1621_v14, %v1619_v11  ;;  %v739_v5 = vpop.permute.xlu0 %738 }
 0x127   : > { %v1400_v34 = vmul.f32 0.2, %v1102_v25  ;;  %1999 = vmatpush1.bf16.msra.mxu1 %v1678_v53  ;;  %v1494_v41 = vmul.f32 0.2, %v1338_v55  ;;  %v1342_v38 = vadd.f32 %v1341_v48, %v734_v61  ;;  %v1343_v46 = vpop.f32.mrb[15].mxu1  ;;  %v1526_v6 = vmax.f32 %v1098_v42, %v1398_v20 }
 0x128   : > { %v1401_v54 = vmul.f32 0.2, %v1104_v15  ;;  %v1495_v52 = vmul.f32 0.2, %v1340_v29  ;;  %v1344_v1 = vadd.f32 %v1343_v46, %v734_v61  ;;  %v1527_v10 = vmax.f32 %v1100_v28, %v1399_v4 }
 0x129   : > { %v1528_v24 = vmax.f32 %v1102_v25, %v1400_v34  ;;  %v1622_v58 = vmax.f32 %v1338_v55, %v1494_v41  ;;  %v1496_v33 = vmul.f32 0.2, %v1342_v38 }
 0x12a   : > { %v1529_v32 = vmax.f32 %v1104_v15, %v1401_v54  ;;  %v1107_v63 = vpop.f32.mrb[16].mxu0  ;;  %v1623_v49 = vmax.f32 %v1340_v29, %v1495_v52  ;;  %v1497_v9 = vmul.f32 0.2, %v1344_v1  ;;  %v744_v29 = vpop.permute.xlu1 %743 }
 0x12b   : > { %v1680_v11 = vpack.c.bf16 %v1528_v24, %v1526_v6  ;;  %v1108_v14 = vadd.f32 %v1107_v63, %v3408_v2  ;;  %v1109_v53 = vpop.f32.mrb[17].mxu0  ;;  %v1624_v23 = vmax.f32 %v1342_v38, %v1496_v33 }
 0x12c   : > { %v1110_v37 = vadd.f32 %v1109_v53, %v3408_v2  ;;  %v1111_v56 = vpop.f32.mrb[18].mxu0  ;;  %v1681_v48 = vpack.c.bf16 %v1529_v32, %v1527_v10  ;;  %v1625_v61 = vmax.f32 %v1344_v1, %v1497_v9  ;;  %v1347_v42 = vpop.f32.mrb[16].mxu1 }
 0x12d   : > { %v1402_v20 = vmul.f32 0.2, %v1108_v14  ;;  %v1112_v25 = vadd.f32 %v1111_v56, %v3410_v3  ;;  %v1113_v28 = vpop.f32.mrb[19].mxu0  ;;  %v3622_v55 = vpack.c.bf16 %v1624_v23, %v1622_v58  ;;  %v1348_v4 = vadd.f32 %v1347_v42, %v739_v5  ;;  %v1349_v15 = vpop.f32.mrb[17].mxu1 }
 0x12e   : > { %v1403_v34 = vmul.f32 0.2, %v1110_v37  ;;  %v1114_v41 = vadd.f32 %v1113_v28, %v3410_v3  ;;  %2000 = vmatprep.subr.bf16.mxu1 %v1681_v48  ;;  %v1350_v38 = vadd.f32 %v1349_v15, %v739_v5  ;;  %v1351_v46 = vpop.f32.mrb[18].mxu1  ;;  %v3625_v2 = vpack.c.bf16 %v1625_v61, %v1623_v49  ;;  %v749_v48 = vpop.permute.xlu0 %748 }
 0x12f   : > { %v1404_v54 = vmul.f32 0.2, %v1112_v25  ;;  %2001 = vmatpush1.bf16.msra.mxu1 %v1680_v11  ;;  %v1498_v52 = vmul.f32 0.2, %v1348_v4  ;;  %v1352_v1 = vadd.f32 %v1351_v46, %v744_v29  ;;  %v1353_v6 = vpop.f32.mrb[19].mxu1  ;;  %v1530_v10 = vmax.f32 %v1108_v14, %v1402_v20 }
 0x130   : > { %v1405_v24 = vmul.f32 0.2, %v1114_v41  ;;  %v1499_v33 = vmul.f32 0.2, %v1350_v38  ;;  %v1354_v58 = vadd.f32 %v1353_v6, %v744_v29  ;;  %v1531_v53 = vmax.f32 %v1110_v37, %v1403_v34 }
 0x131   : > { %v1532_v32 = vmax.f32 %v1112_v25, %v1404_v54  ;;  %v1626_v63 = vmax.f32 %v1348_v4, %v1498_v52  ;;  %v1500_v9 = vmul.f32 0.2, %v1352_v1 }
 0x132   : > { %v1533_v23 = vmax.f32 %v1114_v41, %v1405_v24  ;;  %v1117_v3 = vpop.f32.mrb[20].mxu0  ;;  %v1627_v56 = vmax.f32 %v1350_v38, %v1499_v33  ;;  %v1501_v5 = vmul.f32 0.2, %v1354_v58  ;;  %v754_v38 = vpop.permute.xlu1 %753 }
 0x133   : > { %v1682_v49 = vpack.c.bf16 %v1532_v32, %v1530_v10  ;;  %v1118_v61 = vadd.f32 %v1117_v3, %v3421_v7  ;;  %v1119_v11 = vpop.f32.mrb[21].mxu0  ;;  %v1628_v42 = vmax.f32 %v1352_v1, %v1500_v9 }
 0x134   : > { %v1120_v28 = vadd.f32 %v1119_v11, %v3421_v7  ;;  %v1121_v15 = vpop.f32.mrb[22].mxu0  ;;  %v1683_v46 = vpack.c.bf16 %v1533_v23, %v1531_v53  ;;  %v1629_v29 = vmax.f32 %v1354_v58, %v1501_v5  ;;  %v1357_v14 = vpop.f32.mrb[20].mxu1 }
 0x135   : > { %v1406_v20 = vmul.f32 0.2, %v1118_v61  ;;  %v1122_v25 = vadd.f32 %v1121_v15, %v3424_v8  ;;  %v1123_v37 = vpop.f32.mrb[23].mxu0  ;;  %v3630_v4 = vpack.c.bf16 %v1628_v42, %v1626_v63  ;;  %v1358_v34 = vadd.f32 %v1357_v14, %v749_v48  ;;  %v1359_v41 = vpop.f32.mrb[21].mxu1 }
 0x136   : > { %v1407_v54 = vmul.f32 0.2, %v1120_v28  ;;  %v1124_v52 = vadd.f32 %v1123_v37, %v3424_v8  ;;  %2002 = vmatprep.subr.bf16.mxu1 %v1683_v46  ;;  %v1360_v1 = vadd.f32 %v1359_v41, %v749_v48  ;;  %v1361_v6 = vpop.f32.mrb[22].mxu1  ;;  %v3633_v7 = vpack.c.bf16 %v1629_v29, %v1627_v56  ;;  %v759_v46 = vpop.permute.xlu0 %758 }
 0x137   : > { %v1408_v24 = vmul.f32 0.2, %v1122_v25  ;;  %2003 = vmatpush1.bf16.msra.mxu1 %v1682_v49  ;;  %v1502_v33 = vmul.f32 0.2, %v1358_v34  ;;  %v1362_v58 = vadd.f32 %v1361_v6, %v754_v38  ;;  %v1363_v10 = vpop.f32.mrb[23].mxu1  ;;  %v1534_v53 = vmax.f32 %v1118_v61, %v1406_v20 }
 0x138   : > { %v1409_v32 = vmul.f32 0.2, %v1124_v52  ;;  %v1503_v9 = vmul.f32 0.2, %v1360_v1  ;;  %v1364_v63 = vadd.f32 %v1363_v10, %v754_v38  ;;  %v1535_v11 = vmax.f32 %v1120_v28, %v1407_v54 }
 0x139   : > { %v1536_v23 = vmax.f32 %v1122_v25, %v1408_v24  ;;  %v1630_v3 = vmax.f32 %v1358_v34, %v1502_v33  ;;  %v1504_v5 = vmul.f32 0.2, %v1362_v58 }
 0x13a   : > { %v1537_v42 = vmax.f32 %v1124_v52, %v1409_v32  ;;  %v1127_v8 = vpop.f32.mrb[24].mxu0  ;;  %v1631_v15 = vmax.f32 %v1360_v1, %v1503_v9  ;;  %v1505_v48 = vmul.f32 0.2, %v1364_v63  ;;  %v764_v1 = vpop.permute.xlu1 %763 }
 0x13b   : > { %v1684_v56 = vpack.c.bf16 %v1536_v23, %v1534_v53  ;;  %v1128_v29 = vadd.f32 %v1127_v8, %v3433_v12  ;;  %v1129_v49 = vpop.f32.mrb[25].mxu0  ;;  %v1632_v14 = vmax.f32 %v1362_v58, %v1504_v5 }
 0x13c   : > { %v1130_v37 = vadd.f32 %v1129_v49, %v3433_v12  ;;  %v1131_v41 = vpop.f32.mrb[26].mxu0  ;;  %v1685_v6 = vpack.c.bf16 %v1537_v42, %v1535_v11  ;;  %v1633_v38 = vmax.f32 %v1364_v63, %v1505_v48  ;;  %v1367_v61 = vpop.f32.mrb[24].mxu1 }
 0x13d   : > { %v1410_v20 = vmul.f32 0.2, %v1128_v29  ;;  %v1132_v25 = vadd.f32 %v1131_v41, %v3435_v13  ;;  %v1133_v28 = vpop.f32.mrb[27].mxu0  ;;  %v3638_v34 = vpack.c.bf16 %v1632_v14, %v1630_v3  ;;  %v1368_v54 = vadd.f32 %v1367_v61, %v759_v46  ;;  %v1369_v52 = vpop.f32.mrb[25].mxu1 }
 0x13e   : > { %v1411_v24 = vmul.f32 0.2, %v1130_v37  ;;  %v1134_v33 = vadd.f32 %v1133_v28, %v3435_v13  ;;  %2004 = vmatprep.subr.bf16.mxu1 %v1685_v6  ;;  %v1370_v58 = vadd.f32 %v1369_v52, %v759_v46  ;;  %v1371_v10 = vpop.f32.mrb[26].mxu1  ;;  %v3641_v12 = vpack.c.bf16 %v1633_v38, %v1631_v15  ;;  %v769_v6 = vpop.permute.xlu0 %768 }
 0x13f   : > { %v1412_v32 = vmul.f32 0.2, %v1132_v25  ;;  %2005 = vmatpush1.bf16.msra.mxu1 %v1684_v56  ;;  %v1506_v9 = vmul.f32 0.2, %v1368_v54  ;;  %v1372_v63 = vadd.f32 %v1371_v10, %v764_v1  ;;  %v1373_v53 = vpop.f32.mrb[27].mxu1  ;;  %v1538_v11 = vmax.f32 %v1128_v29, %v1410_v20 }
 0x140   : > { %v1413_v23 = vmul.f32 0.2, %v1134_v33  ;;  %v1507_v5 = vmul.f32 0.2, %v1370_v58  ;;  %v1374_v3 = vadd.f32 %v1373_v53, %v764_v1  ;;  %v1539_v49 = vmax.f32 %v1130_v37, %v1411_v24 }
 0x141   : > { %v1540_v42 = vmax.f32 %v1132_v25, %v1412_v32  ;;  %v1634_v8 = vmax.f32 %v1368_v54, %v1506_v9  ;;  %v1508_v48 = vmul.f32 0.2, %v1372_v63 }
 0x142   : > { %v1541_v14 = vmax.f32 %v1134_v33, %v1413_v23  ;;  %v1137_v13 = vpop.f32.mrb[28].mxu0  ;;  %v1635_v41 = vmax.f32 %v1370_v58, %v1507_v5  ;;  %v1509_v46 = vmul.f32 0.2, %v1374_v3  ;;  %v774_v58 = vpop.permute.xlu1 %773 }
 0x143   : > { %v1686_v15 = vpack.c.bf16 %v1540_v42, %v1538_v11  ;;  %v1138_v38 = vadd.f32 %v1137_v13, %v3446_v17  ;;  %v1139_v56 = vpop.f32.mrb[29].mxu0  ;;  %v1636_v61 = vmax.f32 %v1372_v63, %v1508_v48 }
 0x144   : > { %v1140_v28 = vadd.f32 %v1139_v56, %v3446_v17  ;;  %v1141_v52 = vpop.f32.mrb[30].mxu0  ;;  %v1687_v10 = vpack.c.bf16 %v1541_v14, %v1539_v49  ;;  %v1637_v1 = vmax.f32 %v1374_v3, %v1509_v46  ;;  %v1377_v29 = vpop.f32.mrb[28].mxu1 }
 0x145   : > { %v1414_v20 = vmul.f32 0.2, %v1138_v38  ;;  %v1142_v25 = vadd.f32 %v1141_v52, %v3449_v18  ;;  %v1143_v37 = vpop.f32.mrb[31].mxu0  ;;  %v3646_v54 = vpack.c.bf16 %v1636_v61, %v1634_v8  ;;  %v1378_v24 = vadd.f32 %v1377_v29, %v769_v6  ;;  %v1379_v33 = vpop.f32.mrb[29].mxu1 }
 0x146   : > { %v1415_v32 = vmul.f32 0.2, %v1140_v28  ;;  %v1144_v9 = vadd.f32 %v1143_v37, %v3449_v18  ;;  %2006 = vmatprep.subr.bf16.mxu1 %v1687_v10  ;;  %v1380_v63 = vadd.f32 %v1379_v33, %v769_v6  ;;  %v1381_v53 = vpop.f32.mrb[30].mxu1  ;;  %v3649_v17 = vpack.c.bf16 %v1637_v1, %v1635_v41 }
 0x147   : > { %v1416_v23 = vmul.f32 0.2, %v1142_v25  ;;  %2007 = vmatpush1.bf16.msra.mxu1 %v1686_v15  ;;  %v1510_v5 = vmul.f32 0.2, %v1378_v24  ;;  %v1382_v3 = vadd.f32 %v1381_v53, %v774_v58  ;;  %v1383_v11 = vpop.f32.mrb[31].mxu1  ;;  %v1542_v49 = vmax.f32 %v1138_v38, %v1414_v20 }
 0x148   : > { %v1417_v42 = vmul.f32 0.2, %v1144_v9  ;;  %v1511_v48 = vmul.f32 0.2, %v1380_v63  ;;  %v1384_v8 = vadd.f32 %v1383_v11, %v774_v58  ;;  %v1543_v56 = vmax.f32 %v1140_v28, %v1415_v32 }
 0x149   : > { %v1544_v14 = vmax.f32 %v1142_v25, %v1416_v23  ;;  %v1638_v13 = vmax.f32 %v1378_v24, %v1510_v5  ;;  %v1512_v46 = vmul.f32 0.2, %v1382_v3 }
 0x14a   : > { %v1545_v61 = vmax.f32 %v1144_v9, %v1417_v42  ;;  %v1147_v18 = vpop.f32.mrb[32].mxu0  ;;  %v1639_v52 = vmax.f32 %v1380_v63, %v1511_v48  ;;  %v1513_v6 = vmul.f32 0.2, %v1384_v8 }
 0x14b   : > { %v1688_v10 = vpack.c.bf16 %v1544_v14, %v1542_v49  ;;  %v1148_v41 = vadd.f32 %v1147_v18, %v3458_v21  ;;  %v1149_v1 = vpop.f32.mrb[33].mxu0  ;;  %v1640_v15 = vmax.f32 %v1382_v3, %v1512_v46 }
 0x14c   : > { %v1150_v29 = vadd.f32 %v1149_v1, %v3458_v21  ;;  %v1151_v37 = vpop.f32.mrb[34].mxu0  ;;  %v1689_v33 = vpack.c.bf16 %v1545_v61, %v1543_v56  ;;  %v1641_v53 = vmax.f32 %v1384_v8, %v1513_v6 }
 0x14d   : > { %v1418_v58 = vmul.f32 0.2, %v1148_v41  ;;  %v1152_v38 = vadd.f32 %v1151_v37, %v3460_v22  ;;  %v1153_v20 = vpop.f32.mrb[35].mxu0  ;;  %v3654_v25 = vpack.c.bf16 %v1640_v15, %v1638_v13 }
 0x14e   : > { %v1419_v28 = vmul.f32 0.2, %v1150_v29  ;;  %v1154_v24 = vadd.f32 %v1153_v20, %v3460_v22  ;;  %2008 = vmatprep.subr.bf16.mxu1 %v1689_v33  ;;  %v3657_v32 = vpack.c.bf16 %v1641_v53, %v1639_v52 }
 0x14f   : > { %v1420_v9 = vmul.f32 0.2, %v1152_v38  ;;  %2009 = vmatpush1.bf16.msra.mxu1 %v1688_v10  ;;  %v1546_v23 = vmax.f32 %v1148_v41, %v1418_v58 }
 0x150   : > { %v1421_v63 = vmul.f32 0.2, %v1154_v24  ;;  %v1547_v5 = vmax.f32 %v1150_v29, %v1419_v28 }
 0x151   : > { %v1548_v21 = vmax.f32 %v1152_v38, %v1420_v9 }
 0x152   : > { %v1549_v3 = vmax.f32 %v1154_v24, %v1421_v63  ;;  %v1157_v11 = vpop.f32.mrb[36].mxu0 }
 0x153   : > { %v1690_v42 = vpack.c.bf16 %v1548_v21, %v1546_v23  ;;  %v1158_v48 = vadd.f32 %v1157_v11, %v3471_v26  ;;  %v1159_v8 = vpop.f32.mrb[37].mxu0 }
 0x154   : > { %v1160_v49 = vadd.f32 %v1159_v8, %v3471_v26  ;;  %v1161_v14 = vpop.f32.mrb[38].mxu0  ;;  %v1691_v13 = vpack.c.bf16 %v1549_v3, %v1547_v5 }
 0x155   : > { %v1422_v22 = vmul.f32 0.2, %v1158_v48  ;;  %v1162_v46 = vadd.f32 %v1161_v14, %v3474_v27  ;;  %v1163_v56 = vpop.f32.mrb[39].mxu0 }
 0x156   : > { %v1423_v61 = vmul.f32 0.2, %v1160_v49  ;;  %v1164_v18 = vadd.f32 %v1163_v56, %v3474_v27  ;;  %2010 = vmatprep.subr.bf16.mxu1 %v1691_v13 }
 0x157   : > { %v1424_v52 = vmul.f32 0.2, %v1162_v46  ;;  %2011 = vmatpush1.bf16.msra.mxu1 %v1690_v42  ;;  %v1550_v10 = vmax.f32 %v1158_v48, %v1422_v22 }
 0x158   : > { %v1425_v6 = vmul.f32 0.2, %v1164_v18  ;;  %v1551_v1 = vmax.f32 %v1160_v49, %v1423_v61 }
 0x159   : > { %v1552_v41 = vmax.f32 %v1162_v46, %v1424_v52 }
 0x15a   : > { %v1553_v15 = vmax.f32 %v1164_v18, %v1425_v6  ;;  %v1167_v29 = vpop.f32.mrb[40].mxu0 }
 0x15b   : > { %v1692_v37 = vpack.c.bf16 %v1552_v41, %v1550_v10  ;;  %v1168_v26 = vadd.f32 %v1167_v29, %v3483_v30  ;;  %v1169_v33 = vpop.f32.mrb[41].mxu0 }
 0x15c   : > { %v1170_v53 = vadd.f32 %v1169_v33, %v3483_v30  ;;  %v1171_v58 = vpop.f32.mrb[42].mxu0  ;;  %v1693_v38 = vpack.c.bf16 %v1553_v15, %v1551_v1 }
 0x15d   : > { %v1426_v20 = vmul.f32 0.2, %v1168_v26  ;;  %v1172_v27 = vadd.f32 %v1171_v58, %v3485_v31  ;;  %v1173_v28 = vpop.f32.mrb[43].mxu0 }
 0x15e   : > { %v1427_v24 = vmul.f32 0.2, %v1170_v53  ;;  %v1174_v9 = vadd.f32 %v1173_v28, %v3485_v31  ;;  %2012 = vmatprep.subr.bf16.mxu1 %v1693_v38 }
 0x15f   : > { %v1428_v63 = vmul.f32 0.2, %v1172_v27  ;;  %2013 = vmatpush1.bf16.msra.mxu1 %v1692_v37  ;;  %v1554_v21 = vmax.f32 %v1168_v26, %v1426_v20 }
 0x160   : > { %v1429_v23 = vmul.f32 0.2, %v1174_v9  ;;  %v1555_v3 = vmax.f32 %v1170_v53, %v1427_v24 }
 0x161   : > { %v1556_v5 = vmax.f32 %v1172_v27, %v1428_v63 }
 0x162   : > { %v1557_v11 = vmax.f32 %v1174_v9, %v1429_v23  ;;  %v1177_v42 = vpop.f32.mrb[44].mxu0 }
 0x163   : > { %v1694_v48 = vpack.c.bf16 %v1556_v5, %v1554_v21  ;;  %v1178_v30 = vadd.f32 %v1177_v42, %v3496_v35  ;;  %v1179_v8 = vpop.f32.mrb[45].mxu0 }
 0x164   : > { %v1180_v49 = vadd.f32 %v1179_v8, %v3496_v35  ;;  %v1181_v14 = vpop.f32.mrb[46].mxu0  ;;  %v1695_v13 = vpack.c.bf16 %v1557_v11, %v1555_v3 }
 0x165   : > { %v1430_v22 = vmul.f32 0.2, %v1178_v30  ;;  %v1182_v31 = vadd.f32 %v1181_v14, %v3499_v36  ;;  %v1183_v46 = vpop.f32.mrb[47].mxu0 }
 0x166   : > { %v1431_v56 = vmul.f32 0.2, %v1180_v49  ;;  %v1184_v61 = vadd.f32 %v1183_v46, %v3499_v36  ;;  %2014 = vmatprep.subr.bf16.mxu1 %v1695_v13 }
 0x167   : > { %v1432_v18 = vmul.f32 0.2, %v1182_v31  ;;  %2015 = vmatpush1.bf16.msra.mxu1 %v1694_v48  ;;  %v1558_v6 = vmax.f32 %v1178_v30, %v1430_v22 }
 0x168   : > { %v1433_v52 = vmul.f32 0.2, %v1184_v61  ;;  %v1559_v41 = vmax.f32 %v1180_v49, %v1431_v56 }
 0x169   : > { %v1560_v10 = vmax.f32 %v1182_v31, %v1432_v18 }
 0x16a   : > { %v1561_v1 = vmax.f32 %v1184_v61, %v1433_v52  ;;  %v1187_v15 = vpop.f32.mrb[48].mxu0 }
 0x16b   : > { %v1696_v29 = vpack.c.bf16 %v1560_v10, %v1558_v6  ;;  %v1188_v35 = vadd.f32 %v1187_v15, %v3508_v39  ;;  %v1189_v37 = vpop.f32.mrb[49].mxu0 }
 0x16c   : > { %v1190_v26 = vadd.f32 %v1189_v37, %v3508_v39  ;;  %v1191_v33 = vpop.f32.mrb[50].mxu0  ;;  %v1697_v53 = vpack.c.bf16 %v1561_v1, %v1559_v41 }
 0x16d   : > { %v1434_v58 = vmul.f32 0.2, %v1188_v35  ;;  %v1192_v36 = vadd.f32 %v1191_v33, %v3510_v40  ;;  %v1193_v38 = vpop.f32.mrb[51].mxu0 }
 0x16e   : > { %v1435_v20 = vmul.f32 0.2, %v1190_v26  ;;  %v1194_v27 = vadd.f32 %v1193_v38, %v3510_v40  ;;  %2016 = vmatprep.subr.bf16.mxu1 %v1697_v53 }
 0x16f   : > { %v1436_v28 = vmul.f32 0.2, %v1192_v36  ;;  %2017 = vmatpush1.bf16.msra.mxu1 %v1696_v29  ;;  %v1562_v9 = vmax.f32 %v1188_v35, %v1434_v58 }
 0x170   : > { %v1437_v24 = vmul.f32 0.2, %v1194_v27  ;;  %v1563_v23 = vmax.f32 %v1190_v26, %v1435_v20 }
 0x171   : > { %v1564_v63 = vmax.f32 %v1192_v36, %v1436_v28 }
 0x172   : > { %v1565_v21 = vmax.f32 %v1194_v27, %v1437_v24  ;;  %v1197_v5 = vpop.f32.mrb[52].mxu0 }
 0x173   : > { %v1698_v3 = vpack.c.bf16 %v1564_v63, %v1562_v9  ;;  %v1198_v39 = vadd.f32 %v1197_v5, %v3521_v44  ;;  %v1199_v11 = vpop.f32.mrb[53].mxu0 }
 0x174   : > { %v1200_v42 = vadd.f32 %v1199_v11, %v3521_v44  ;;  %v1201_v48 = vpop.f32.mrb[54].mxu0  ;;  %v1699_v30 = vpack.c.bf16 %v1565_v21, %v1563_v23 }
 0x175   : > { %v1438_v8 = vmul.f32 0.2, %v1198_v39  ;;  %v1202_v40 = vadd.f32 %v1201_v48, %v3524_v45  ;;  %v1203_v49 = vpop.f32.mrb[55].mxu0 }
 0x176   : > { %v1439_v14 = vmul.f32 0.2, %v1200_v42  ;;  %v1204_v13 = vadd.f32 %v1203_v49, %v3524_v45  ;;  %2018 = vmatprep.subr.bf16.mxu1 %v1699_v30 }
 0x177   : > { %v1440_v22 = vmul.f32 0.2, %v1202_v40  ;;  %2019 = vmatpush1.bf16.msra.mxu1 %v1698_v3  ;;  %v1566_v46 = vmax.f32 %v1198_v39, %v1438_v8 }
 0x178   : > { %v1441_v31 = vmul.f32 0.2, %v1204_v13  ;;  %v1567_v61 = vmax.f32 %v1200_v42, %v1439_v14 }
 0x179   : > { %v1568_v56 = vmax.f32 %v1202_v40, %v1440_v22 }
 0x17a   : > { %v1569_v18 = vmax.f32 %v1204_v13, %v1441_v31  ;;  %v1207_v52 = vpop.f32.mrb[56].mxu0 }
 0x17b   : > { %v1700_v6 = vpack.c.bf16 %v1568_v56, %v1566_v46  ;;  %v1208_v44 = vadd.f32 %v1207_v52, %v3533_v50  ;;  %v1209_v10 = vpop.f32.mrb[57].mxu0 }
 0x17c   : > { %v1210_v41 = vadd.f32 %v1209_v10, %v3533_v50  ;;  %v1211_v1 = vpop.f32.mrb[58].mxu0  ;;  %v1701_v15 = vpack.c.bf16 %v1569_v18, %v1567_v61  ;;  %v3950_v61 = vld [vmem:[#allocation7_spill] sm:$0xff] }
 0x17d   : > { %v1442_v29 = vmul.f32 0.2, %v1208_v44  ;;  %v1212_v45 = vadd.f32 %v1211_v1, %v3535_v51  ;;  %v1213_v35 = vpop.f32.mrb[59].mxu0 }
 0x17e   : > { %v1443_v37 = vmul.f32 0.2, %v1210_v41  ;;  %v1214_v26 = vadd.f32 %v1213_v35, %v3535_v51  ;;  %2020 = vmatprep.subr.bf16.mxu1 %v1701_v15 }
 0x17f   : > { %v1444_v33 = vmul.f32 0.2, %v1212_v45  ;;  %2021 = vmatpush1.bf16.msra.mxu1 %v1700_v6  ;;  %v1570_v58 = vmax.f32 %v1208_v44, %v1442_v29  ;;  %v2824_v44 = vld [vmem:[%s3913_s3] ss:$16 sps:$4 sm:$0xff]  }
 0x180   : > { %v1445_v53 = vmul.f32 0.2, %v1214_v26  ;;  %v1571_v38 = vmax.f32 %v1210_v41, %v1443_v37 }
 0x181   : > { %v1572_v36 = vmax.f32 %v1212_v45, %v1444_v33 }
 0x182   : > { %v1573_v20 = vmax.f32 %v1214_v26, %v1445_v53  ;;  %v1217_v27 = vpop.f32.mrb[60].mxu0  ;;  %v3951_v26 = vld [vmem:[#allocation8_spill] sm:$0xff] }
 0x183   : > { %v1702_v28 = vpack.c.bf16 %v1572_v36, %v1570_v58  ;;  %v1218_v50 = vadd.f32 %v1217_v27, %v3546_v59  ;;  %v1219_v24 = vpop.f32.mrb[61].mxu0  ;;  %v3952_v27 = vld [vmem:[#allocation9_spill] sm:$0xff] }
 0x184   : > { %v1220_v9 = vadd.f32 %v1219_v24, %v3546_v59  ;;  %v1221_v63 = vpop.f32.mrb[62].mxu0  ;;  %v1703_v23 = vpack.c.bf16 %v1573_v20, %v1571_v38 }
 0x185   : > { %v1446_v21 = vmul.f32 0.2, %v1218_v50  ;;  %v1222_v51 = vadd.f32 %v1221_v63, %v3549_v60  ;;  %v1223_v5 = vpop.f32.mrb[63].mxu0  ;;  %v2829_v63 = vld [vmem:[%s3913_s3 + $0x20] ss:$16 sps:$4 sm:$0xff]  }
 0x186   : > { %v1447_v3 = vmul.f32 0.2, %v1220_v9  ;;  %v1224_v39 = vadd.f32 %v1223_v5, %v3549_v60  ;;  %2022 = vmatprep.subr.bf16.mxu1 %v1703_v23 }
 0x187   : > { %v1448_v11 = vmul.f32 0.2, %v1222_v51  ;;  %2023 = vmatpush1.bf16.msra.mxu1 %v1702_v28  ;;  %v1574_v48 = vmax.f32 %v1218_v50, %v1446_v21  ;;  %v2830_v21 = vld [vmem:[%s3913_s3 + $0x44] ss:$16 sps:$4 sm:$0xff]  }
 0x188   : > { %v1449_v42 = vmul.f32 0.2, %v1224_v39  ;;  %v1575_v8 = vmax.f32 %v1220_v9, %v1447_v3 }
 0x189   : > { %v1576_v30 = vmax.f32 %v1222_v51, %v1448_v11 }
 0x18a   : > { %v1577_v40 = vmax.f32 %v1224_v39, %v1449_v42  ;;  %v1227_v49 = vpop.f32.mrb[64].mxu0 }
 0x18b   : > { %v1704_v14 = vpack.c.bf16 %v1576_v30, %v1574_v48  ;;  %v1228_v59 = vadd.f32 %v1227_v49, %v3552_v0  ;;  %v1229_v13 = vpop.f32.mrb[65].mxu0  ;;  %v3953_v30 = vld [vmem:[#allocation10_spill] sm:$0xff] }
 0x18c   : > { %v1230_v22 = vadd.f32 %v1229_v13, %v3552_v0  ;;  %v1231_v31 = vpop.f32.mrb[66].mxu0  ;;  %v1705_v46 = vpack.c.bf16 %v1577_v40, %v1575_v8  ;;  %v2827_v0 = vld [vmem:[%s3913_s3 + $0x24] ss:$16 sps:$4 sm:$0xff]  }
 0x18d   : > { %v1450_v56 = vmul.f32 0.2, %v1228_v59  ;;  %v1232_v60 = vadd.f32 %v1231_v31, %v3950_v61  ;;  %v1233_v18 = vpop.f32.mrb[67].mxu0 }
 0x18e   : > { %v1451_v52 = vmul.f32 0.2, %v1230_v22  ;;  %v1234_v6 = vadd.f32 %v1233_v18, %v3950_v61  ;;  %2024 = vmatprep.subr.bf16.mxu1 %v1705_v46 }
 0x18f   : > { %v1452_v10 = vmul.f32 0.2, %v1232_v60  ;;  %2025 = vmatpush1.bf16.msra.mxu1 %v1704_v14  ;;  %v1578_v1 = vmax.f32 %v1228_v59, %v1450_v56 }
 0x190   : > { %v1453_v41 = vmul.f32 0.2, %v1234_v6  ;;  %v1579_v29 = vmax.f32 %v1230_v22, %v1451_v52  ;;  %v3954_v22 = vld [vmem:[#allocation11_spill] sm:$0xff] }
 0x191   : > { %v1580_v15 = vmax.f32 %v1232_v60, %v1452_v10  ;;  %v2832_v60 = vld [vmem:[%s3913_s3 + $0x40] ss:$16 sps:$4 sm:$0xff]   ;;  %v2833_v52 = vld [vmem:[%s3913_s3 + $0x64] ss:$16 sps:$4 sm:$0xff]  }
 0x192   : > { %v1581_v45 = vmax.f32 %v1234_v6, %v1453_v41  ;;  %v1237_v35 = vpop.f32.mrb[68].mxu0  ;;  %2027 = vmatmul.mubr.bf16.vlgmr.msra.gmra.mrb[32].mxu1 %v2824_v44 }
 0x193   : > { %v1706_v37 = vpack.c.bf16 %v1580_v15, %v1578_v1  ;;  %v1238_v33 = vadd.f32 %v1237_v35, %v3951_v26  ;;  %v1239_v53 = vpop.f32.mrb[69].mxu0  ;;  %2036 = vmatprep.mubr.bf16.mxu1 %v2827_v0 }
 0x194   : > { %v1240_v58 = vadd.f32 %v1239_v53, %v3951_v26  ;;  %v1241_v36 = vpop.f32.mrb[70].mxu0  ;;  %v1707_v38 = vpack.c.bf16 %v1581_v45, %v1579_v29  ;;  %v3955_v29 = vld [vmem:[#allocation12_spill] sm:$0xff] }
 0x195   : > { %v1454_v20 = vmul.f32 0.2, %v1238_v33  ;;  %v1242_v28 = vadd.f32 %v1241_v36, %v3952_v27  ;;  %v1243_v50 = vpop.f32.mrb[71].mxu0 }
 0x196   : > { %v1455_v24 = vmul.f32 0.2, %v1240_v58  ;;  %v1244_v9 = vadd.f32 %v1243_v50, %v3952_v27  ;;  %2107 = vmatprep.subr.bf16.mxu1 %v1707_v38 }
 0x197   : > { %v1456_v23 = vmul.f32 0.2, %v1242_v28  ;;  %2108 = vmatpush1.bf16.msra.mxu1 %v1706_v37  ;;  %v1582_v5 = vmax.f32 %v1238_v33, %v1454_v20 }
 0x198   : > { %v1457_v51 = vmul.f32 0.2, %v1244_v9  ;;  %v1583_v39 = vmax.f32 %v1240_v58, %v1455_v24  ;;  %v3956_v58 = vld [vmem:[#allocation13_spill] sm:$0xff] }
 0x199   : > { %v1584_v3 = vmax.f32 %v1242_v28, %v1456_v23  ;;  %v2835_v28 = vld [vmem:[%s3913_s3 + $0x60] ss:$16 sps:$4 sm:$0xff]   ;;  %v2836_v24 = vld [vmem:[%s3913_s3 + $0x84] ss:$16 sps:$4 sm:$0xff]  }
 0x19a   : > { %v1585_v11 = vmax.f32 %v1244_v9, %v1457_v51  ;;  %v1247_v42 = vpop.f32.mrb[72].mxu0  ;;  %2037 = vmatmul.mubr.bf16.gmra.mrb[36].mxu1 %v2829_v63 }
 0x19b   : > { %v1708_v48 = vpack.c.bf16 %v1584_v3, %v1582_v5  ;;  %v1248_v8 = vadd.f32 %v1247_v42, %v3953_v30  ;;  %v1249_v40 = vpop.f32.mrb[73].mxu0  ;;  %2046 = vmatprep.mubr.bf16.mxu1 %v2830_v21 }
 0x19c   : > { %v1250_v49 = vadd.f32 %v1249_v40, %v3953_v30  ;;  %v1251_v14 = vpop.f32.mrb[74].mxu0  ;;  %v1709_v59 = vpack.c.bf16 %v1585_v11, %v1583_v39  ;;  %v3957_v39 = vld [vmem:[#allocation14_spill] sm:$0xff] }
 0x19d   : > { %v1458_v13 = vmul.f32 0.2, %v1248_v8  ;;  %v1252_v31 = vadd.f32 %v1251_v14, %v3954_v22  ;;  %v1253_v46 = vpop.f32.mrb[75].mxu0 }
 0x19e   : > { %v1459_v56 = vmul.f32 0.2, %v1250_v49  ;;  %v1254_v61 = vadd.f32 %v1253_v46, %v3954_v22  ;;  %2109 = vmatprep.subr.bf16.mxu1 %v1709_v59 }
 0x19f   : > { %v1460_v18 = vmul.f32 0.2, %v1252_v31  ;;  %2110 = vmatpush1.bf16.msra.mxu1 %v1708_v48  ;;  %v1586_v44 = vmax.f32 %v1248_v8, %v1458_v13 }
 0x1a0   : > { %v1461_v6 = vmul.f32 0.2, %v1254_v61  ;;  %v1587_v0 = vmax.f32 %v1250_v49, %v1459_v56  ;;  %v3958_v49 = vld [vmem:[#allocation15_spill] sm:$0xff] }
 0x1a1   : > { %v1588_v10 = vmax.f32 %v1252_v31, %v1460_v18  ;;  %v2838_v31 = vld [vmem:[%s3913_s3 + $0x80] ss:$16 sps:$4 sm:$0xff]   ;;  %v2839_v56 = vld [vmem:[%s3913_s3 + $0xa4] ss:$16 sps:$4 sm:$0xff]  }
 0x1a2   : > { %v1589_v41 = vmax.f32 %v1254_v61, %v1461_v6  ;;  %v1257_v1 = vpop.f32.mrb[76].mxu0  ;;  %2047 = vmatmul.mubr.bf16.gmra.mrb[40].mxu1 %v2832_v60 }
 0x1a3   : > { %v1710_v15 = vpack.c.bf16 %v1588_v10, %v1586_v44  ;;  %v1258_v45 = vadd.f32 %v1257_v1, %v3955_v29  ;;  %v1259_v35 = vpop.f32.mrb[77].mxu0  ;;  %2056 = vmatprep.mubr.bf16.mxu1 %v2833_v52 }
 0x1a4   : > { %v1260_v37 = vadd.f32 %v1259_v35, %v3955_v29  ;;  %v1261_v26 = vpop.f32.mrb[78].mxu0  ;;  %v1711_v33 = vpack.c.bf16 %v1589_v41, %v1587_v0  ;;  %v3959_v0 = vld [vmem:[#allocation16_spill] sm:$0xff] }
 0x1a5   : > { %v1462_v53 = vmul.f32 0.2, %v1258_v45  ;;  %v1262_v36 = vadd.f32 %v1261_v26, %v3956_v58  ;;  %v1263_v38 = vpop.f32.mrb[79].mxu0 }
 0x1a6   : > { %v1463_v20 = vmul.f32 0.2, %v1260_v37  ;;  %v1264_v27 = vadd.f32 %v1263_v38, %v3956_v58  ;;  %2111 = vmatprep.subr.bf16.mxu1 %v1711_v33 }
 0x1a7   : > { %v1464_v50 = vmul.f32 0.2, %v1262_v36  ;;  %2112 = vmatpush1.bf16.msra.mxu1 %v1710_v15  ;;  %v1590_v63 = vmax.f32 %v1258_v45, %v1462_v53 }
 0x1a8   : > { %v1465_v9 = vmul.f32 0.2, %v1264_v27  ;;  %v1591_v21 = vmax.f32 %v1260_v37, %v1463_v20  ;;  %v3960_v37 = vld [vmem:[#allocation17_spill] sm:$0xff] }
 0x1a9   : > { %v1592_v23 = vmax.f32 %v1262_v36, %v1464_v50  ;;  %v2841_v36 = vld [vmem:[%s3913_s3 + $0xa0] ss:$16 sps:$4 sm:$0xff]   ;;  %v2842_v20 = vld [vmem:[%s3913_s3 + $0xc4] ss:$16 sps:$4 sm:$0xff]  }
 0x1aa   : > { %v1593_v51 = vmax.f32 %v1264_v27, %v1465_v9  ;;  %v1267_v5 = vpop.f32.mrb[80].mxu0  ;;  %2057 = vmatmul.mubr.bf16.gmra.mrb[44].mxu1 %v2835_v28 }
 0x1ab   : > { %v1712_v3 = vpack.c.bf16 %v1592_v23, %v1590_v63  ;;  %v1268_v11 = vadd.f32 %v1267_v5, %v3957_v39  ;;  %v1269_v42 = vpop.f32.mrb[81].mxu0  ;;  %2066 = vmatprep.mubr.bf16.mxu1 %v2836_v24 }
 0x1ac   : > { %v1270_v48 = vadd.f32 %v1269_v42, %v3957_v39  ;;  %v1271_v30 = vpop.f32.mrb[82].mxu0  ;;  %v1713_v8 = vpack.c.bf16 %v1593_v51, %v1591_v21  ;;  %v3961_v21 = vld [vmem:[#allocation18_spill] sm:$0xff] }
 0x1ad   : > { %v1466_v40 = vmul.f32 0.2, %v1268_v11  ;;  %v1272_v14 = vadd.f32 %v1271_v30, %v3958_v49  ;;  %v1273_v59 = vpop.f32.mrb[83].mxu0 }
 0x1ae   : > { %v1467_v13 = vmul.f32 0.2, %v1270_v48  ;;  %v1274_v22 = vadd.f32 %v1273_v59, %v3958_v49  ;;  %2113 = vmatprep.subr.bf16.mxu1 %v1713_v8 }
 0x1af   : > { %v1468_v46 = vmul.f32 0.2, %v1272_v14  ;;  %2114 = vmatpush1.bf16.msra.mxu1 %v1712_v3  ;;  %v1594_v60 = vmax.f32 %v1268_v11, %v1466_v40 }
 0x1b0   : > { %v1469_v61 = vmul.f32 0.2, %v1274_v22  ;;  %v1595_v52 = vmax.f32 %v1270_v48, %v1467_v13  ;;  %v3962_v48 = vld [vmem:[#allocation19_spill] sm:$0xff] }
 0x1b1   : > { %v1596_v18 = vmax.f32 %v1272_v14, %v1468_v46  ;;  %v2844_v14 = vld [vmem:[%s3913_s3 + $0xc0] ss:$16 sps:$4 sm:$0xff]   ;;  %v2845_v13 = vld [vmem:[%s3913_s3 + $0xe4] ss:$16 sps:$4 sm:$0xff]  }
 0x1b2   : > { %v1597_v6 = vmax.f32 %v1274_v22, %v1469_v61  ;;  %v1277_v44 = vpop.f32.mrb[84].mxu0  ;;  %2067 = vmatmul.mubr.bf16.gmra.mrb[48].mxu1 %v2838_v31 }
 0x1b3   : > { %v1714_v10 = vpack.c.bf16 %v1596_v18, %v1594_v60  ;;  %v1278_v41 = vadd.f32 %v1277_v44, %v3959_v0  ;;  %v1279_v1 = vpop.f32.mrb[85].mxu0  ;;  %2076 = vmatprep.mubr.bf16.mxu1 %v2839_v56 }
 0x1b4   : > { %v1280_v15 = vadd.f32 %v1279_v1, %v3959_v0  ;;  %v1281_v29 = vpop.f32.mrb[86].mxu0  ;;  %v1715_v45 = vpack.c.bf16 %v1597_v6, %v1595_v52  ;;  %v3963_v52 = vld [vmem:[#allocation20_spill] sm:$0xff] }
 0x1b5   : > { %v1470_v35 = vmul.f32 0.2, %v1278_v41  ;;  %v1282_v26 = vadd.f32 %v1281_v29, %v3960_v37  ;;  %v1283_v33 = vpop.f32.mrb[87].mxu0 }
 0x1b6   : > { %v1471_v53 = vmul.f32 0.2, %v1280_v15  ;;  %v1284_v58 = vadd.f32 %v1283_v33, %v3960_v37  ;;  %2115 = vmatprep.subr.bf16.mxu1 %v1715_v45 }
 0x1b7   : > { %v1472_v38 = vmul.f32 0.2, %v1282_v26  ;;  %2116 = vmatpush1.bf16.msra.mxu1 %v1714_v10  ;;  %v1598_v28 = vmax.f32 %v1278_v41, %v1470_v35 }
 0x1b8   : > { %v1473_v27 = vmul.f32 0.2, %v1284_v58  ;;  %v1599_v24 = vmax.f32 %v1280_v15, %v1471_v53  ;;  %v3964_v15 = vld [vmem:[#allocation21_spill] sm:$0xff] }
 0x1b9   : > { %v1600_v50 = vmax.f32 %v1282_v26, %v1472_v38  ;;  %v2847_v26 = vld [vmem:[%s3913_s3 + $0xe0] ss:$16 sps:$4 sm:$0xff]   ;;  %v2850_v53 = vld [vmem:[%s3913_s3 + $0xc] ss:$16 sps:$4 sm:$0xff]  }
 0x1ba   : > { %v1601_v9 = vmax.f32 %v1284_v58, %v1473_v27  ;;  %v1287_v63 = vpop.f32.mrb[88].mxu0  ;;  %2077 = vmatmul.mubr.bf16.gmra.mrb[52].mxu1 %v2841_v36 }
 0x1bb   : > { %v1716_v23 = vpack.c.bf16 %v1600_v50, %v1598_v28  ;;  %v1288_v51 = vadd.f32 %v1287_v63, %v3961_v21  ;;  %v1289_v5 = vpop.f32.mrb[89].mxu0  ;;  %2086 = vmatprep.mubr.bf16.mxu1 %v2842_v20 }
 0x1bc   : > { %v1290_v3 = vadd.f32 %v1289_v5, %v3961_v21  ;;  %v1291_v39 = vpop.f32.mrb[90].mxu0  ;;  %v1717_v11 = vpack.c.bf16 %v1601_v9, %v1599_v24  ;;  %v1762_v24 = vpop.permute.xlu1 %1761 }
 0x1bd   : > { %v1474_v42 = vmul.f32 0.2, %v1288_v51  ;;  %v1292_v30 = vadd.f32 %v1291_v39, %v3962_v48  ;;  %v1293_v8 = vpop.f32.mrb[91].mxu0 }
 0x1be   : > { %v1475_v40 = vmul.f32 0.2, %v1290_v3  ;;  %v1294_v49 = vadd.f32 %v1293_v8, %v3962_v48  ;;  %2117 = vmatprep.subr.bf16.mxu1 %v1717_v11 }
 0x1bf   : > { %v1476_v59 = vmul.f32 0.2, %v1292_v30  ;;  %2118 = vmatpush1.bf16.msra.mxu1 %v1716_v23  ;;  %v1602_v31 = vmax.f32 %v1288_v51, %v1474_v42 }
 0x1c0   : > { %v1477_v22 = vmul.f32 0.2, %v1294_v49  ;;  %v1603_v56 = vmax.f32 %v1290_v3, %v1475_v40  ;;  %v1772_v63 = vpop.permute.xlu1 %1771 }
 0x1c1   : > { %v1604_v46 = vmax.f32 %v1292_v30, %v1476_v59 }
 0x1c2   : > { %v1605_v61 = vmax.f32 %v1294_v49, %v1477_v22  ;;  %v1297_v60 = vpop.f32.mrb[92].mxu0  ;;  %2087 = vmatmul.mubr.bf16.gmra.mrb[56].mxu1 %v2844_v14 }
 0x1c3   : > { %v1718_v18 = vpack.c.bf16 %v1604_v46, %v1602_v31  ;;  %v1298_v6 = vadd.f32 %v1297_v60, %v3963_v52  ;;  %v1299_v44 = vpop.f32.mrb[93].mxu0  ;;  %2096 = vmatprep.mubr.bf16.mxu1 %v2845_v13 }
 0x1c4   : > { %v1300_v10 = vadd.f32 %v1299_v44, %v3963_v52  ;;  %v1301_v0 = vpop.f32.mrb[94].mxu0  ;;  %v1719_v41 = vpack.c.bf16 %v1605_v61, %v1603_v56  ;;  %v2303_v21 = vpop.permute.xlu1 %2302 }
 0x1c5   : > { %v1478_v1 = vmul.f32 0.2, %v1298_v6  ;;  %v1302_v29 = vadd.f32 %v1301_v0, %v3964_v15  ;;  %v1303_v45 = vpop.f32.mrb[95].mxu0 }
 0x1c6   : > { %v1479_v35 = vmul.f32 0.2, %v1300_v10  ;;  %v1304_v37 = vadd.f32 %v1303_v45, %v3964_v15  ;;  %2119 = vmatprep.subr.bf16.mxu1 %v1719_v41 }
 0x1c7   : > { %v1480_v33 = vmul.f32 0.2, %v1302_v29  ;;  %2120 = vmatpush1.bf16.msra.mxu1 %v1718_v18  ;;  %v1606_v36 = vmax.f32 %v1298_v6, %v1478_v1 }
 0x1c8   : > { %v1481_v58 = vmul.f32 0.2, %v1304_v37  ;;  %v1607_v20 = vmax.f32 %v1300_v10, %v1479_v35  ;;  %v3828_v5 = vpop.permute.xlu1 %1781 }
 0x1c9   : > { %v1608_v38 = vmax.f32 %v1302_v29, %v1480_v33 }
 0x1ca   : > { %v1609_v27 = vmax.f32 %v1304_v37, %v1481_v58  ;;  %2097 = vmatmul.mubr.bf16.gmra.mrb[60].mxu1 %v2847_v26 }
 0x1cb   : > { %v1720_v28 = vpack.c.bf16 %v1608_v38, %v1606_v36  ;;  %2139 = vmatprep.mubr.bf16.mxu1 %v2850_v53 }
 0x1cc   : > { %v1721_v50 = vpack.c.bf16 %v1609_v27, %v1607_v20  ;;  %v3830_v39 = vpop.permute.xlu1 %1786 }
 0x1ce   : > { %2121 = vmatprep.subr.bf16.mxu1 %v1721_v50 }
 0x1cf   : > { %2122 = vmatpush1.bf16.msra.mxu1 %v1720_v28 }
 0x1d0   : > { %2123 = vmatprep.subr.bf16.mxu1 %v3601_v47  ;;  %v2851_v47 = vld [vmem:[%s3913_s3 + $0x2c] ss:$16 sps:$4 sm:$0xff]   ;;  %v3832_v8 = vpop.permute.xlu1 %1791 }
 0x1d3   : > { %2124 = vmatpush1.bf16.msra.mxu1 %v3598_v16  ;;  %v2848_v16 = vld [vmem:[%s3913_s3 + $0x8] ss:$16 sps:$4 sm:$0xff]  }
 0x1d4   : > { %2125 = vmatprep.subr.bf16.mxu1 %v3609_v57  ;;  %v2854_v57 = vld [vmem:[%s3913_s3 + $0x4c] ss:$16 sps:$4 sm:$0xff]   ;;  %v3834_v6 = vpop.permute.xlu1 %1796 }
 0x1d7   : > { %2126 = vmatpush1.bf16.msra.mxu1 %v3606_v19  ;;  %v2853_v19 = vld [vmem:[%s3913_s3 + $0x28] ss:$16 sps:$4 sm:$0xff]  }
 0x1d8   : > { %2127 = vmatprep.subr.bf16.mxu1 %v3617_v62  ;;  %v2857_v62 = vld [vmem:[%s3913_s3 + $0x6c] ss:$16 sps:$4 sm:$0xff]  }
 0x1db   : > { %2128 = vmatpush1.bf16.msra.mxu1 %v3614_v43  ;;  %v2856_v43 = vld [vmem:[%s3913_s3 + $0x48] ss:$16 sps:$4 sm:$0xff]  }
 0x1dc   : > { %2129 = vmatprep.subr.bf16.mxu1 %v3625_v2  ;;  %v2860_v2 = vld [vmem:[%s3913_s3 + $0x8c] ss:$16 sps:$4 sm:$0xff]  }
 0x1df   : > { %2130 = vmatpush1.bf16.msra.mxu1 %v3622_v55  ;;  %v2859_v55 = vld [vmem:[%s3913_s3 + $0x68] ss:$16 sps:$4 sm:$0xff]  }
 0x1e0   : > { %2131 = vmatprep.subr.bf16.mxu1 %v3633_v7  ;;  %v2863_v7 = vld [vmem:[%s3913_s3 + $0xac] ss:$16 sps:$4 sm:$0xff]  }
 0x1e3   : > { %2132 = vmatpush1.bf16.msra.mxu1 %v3630_v4  ;;  %v2862_v4 = vld [vmem:[%s3913_s3 + $0x88] ss:$16 sps:$4 sm:$0xff]  }
 0x1e4   : > { %2133 = vmatprep.subr.bf16.mxu1 %v3641_v12  ;;  %v2866_v12 = vld [vmem:[%s3913_s3 + $0xcc] ss:$16 sps:$4 sm:$0xff]  }
 0x1e7   : > { %2134 = vmatpush1.bf16.msra.mxu1 %v3638_v34  ;;  %v2865_v34 = vld [vmem:[%s3913_s3 + $0xa8] ss:$16 sps:$4 sm:$0xff]  }
 0x1e8   : > { %2135 = vmatprep.subr.bf16.mxu1 %v3649_v17  ;;  %v2869_v17 = vld [vmem:[%s3913_s3 + $0xec] ss:$16 sps:$4 sm:$0xff]  }
 0x1eb   : > { %2136 = vmatpush1.bf16.msra.mxu1 %v3646_v54  ;;  %v2868_v54 = vld [vmem:[%s3913_s3 + $0xc8] ss:$16 sps:$4 sm:$0xff]  }
 0x1ec   : > { %2137 = vmatprep.subr.bf16.mxu1 %v3657_v32  ;;  %v1757_v32 = vpop.permute.xlu0 %1756 }
 0x1ef   : > { %2138 = vmatpush1.bf16.msra.mxu1 %v3654_v25  ;;  %v2871_v25 = vld [vmem:[%s3913_s3 + $0xe8] ss:$16 sps:$4 sm:$0xff]  }
 0x1f0   : > { %v1767_v9 = vpop.permute.xlu0 %1766 }
 0x1f2   : > { %2140 = vmatmul.mubr.bf16.vlgmr.msra.gmra.mrb[32].mxu1 %v2848_v16  ;;  %v3836_v16 = vpop.permute.xlu1 %1801 }
 0x1f3   : > { %2149 = vmatprep.mubr.bf16.mxu1 %v2851_v47 }
 0x1f4   : > { %v1777_v23 = vpop.permute.xlu0 %1776 }
 0x1f8   : > { %v2308_v51 = vpop.permute.xlu0 %2307 }
 0x1fa   : > { %2150 = vmatmul.mubr.bf16.gmra.mrb[36].mxu1 %v2853_v19 }
 0x1fb   : > { %2159 = vmatprep.mubr.bf16.mxu1 %v2854_v57 }
 0x1fc   : > { %v2313_v3 = vpop.permute.xlu0 %2312 }
 0x200   : > { %v2318_v11 = vpop.permute.xlu0 %2317 }
 0x202   : > { %2160 = vmatmul.mubr.bf16.gmra.mrb[40].mxu1 %v2856_v43 }
 0x203   : > { %2169 = vmatprep.mubr.bf16.mxu1 %v2857_v62 }
 0x204   : > { %v2323_v61 = vpop.permute.xlu0 %2322 }
 0x208   : > { %v2328_v36 = vpop.permute.xlu0 %2327 }
 0x20a   : > { %2170 = vmatmul.mubr.bf16.gmra.mrb[44].mxu1 %v2859_v55 }
 0x20b   : > { %2179 = vmatprep.mubr.bf16.mxu1 %v2860_v2 }
 0x212   : > { %2180 = vmatmul.mubr.bf16.gmra.mrb[48].mxu1 %v2862_v4 }
 0x213   : > { %2189 = vmatprep.mubr.bf16.mxu1 %v2863_v7 }
 0x21a   : > { %2190 = vmatmul.mubr.bf16.gmra.mrb[52].mxu1 %v2865_v34 }
 0x21b   : > { %2199 = vmatprep.mubr.bf16.mxu1 %v2866_v12 }
 0x222   : > { %2200 = vmatmul.mubr.bf16.gmra.mrb[56].mxu1 %v2868_v54  ;;  %v2333_v54 = vpop.permute.xlu0 %2332 }
 0x223   : > { %2209 = vmatprep.mubr.bf16.mxu1 %v2869_v17 }
 0x22a   : > { %2210 = vmatmul.mubr.bf16.gmra.mrb[60].mxu1 %v2871_v25 }
 0x2c5   : > { %v2141_v42 = vpop.f32.mrb[32].mxu1 }
 0x2c6   : > { %v2685_v48 = vadd.f32 %v2141_v42, %v1757_v32  ;;  %v2143_v30 = vpop.f32.mrb[33].mxu1  ;;  %v3839_v42 = vpop.permute.xlu1 %1806 }
 0x2c7   : > { %v2686_v40 = vadd.f32 %v2143_v30, %v1757_v32  ;;  %v2145_v49 = vpop.f32.mrb[34].mxu1 }
 0x2c8   : > { %v2220_v14 = vmul.f32 0.2, %v2685_v48  ;;  %v2687_v59 = vadd.f32 %v2145_v49, %v1762_v24  ;;  %v2147_v13 = vpop.f32.mrb[35].mxu1 }
 0x2c9   : > { %v2221_v22 = vmul.f32 0.2, %v2686_v40  ;;  %v2688_v31 = vadd.f32 %v2147_v13, %v1762_v24 }
 0x2ca   : > { %v2252_v46 = vmax.f32 %v2685_v48, %v2220_v14  ;;  %v2222_v56 = vmul.f32 0.2, %v2687_v59 }
 0x2cb   : > { %v2253_v60 = vmax.f32 %v2686_v40, %v2221_v22  ;;  %v2223_v18 = vmul.f32 0.2, %v2688_v31 }
 0x2cc   : > { %v2254_v52 = vmax.f32 %v2687_v59, %v2222_v56  ;;  %v2380_v0 = vmul.f32 %v2303_v21, %v2252_v46 }
 0x2cd   : > { %v2255_v44 = vmax.f32 %v2688_v31, %v2223_v18  ;;  %v2151_v10 = vpop.f32.mrb[36].mxu1  ;;  %v2381_v29 = vmul.f32 %v2303_v21, %v2253_v60 }
 0x2ce   : > { %v2382_v41 = vmul.f32 %v2308_v51, %v2254_v52  ;;  %v2689_v1 = vadd.f32 %v2151_v10, %v1767_v9  ;;  %v2153_v15 = vpop.f32.mrb[37].mxu1 }
 0x2cf   : > { %v2383_v45 = vmul.f32 %v2308_v51, %v2255_v44  ;;  %v2690_v35 = vadd.f32 %v2153_v15, %v1767_v9  ;;  %v2155_v37 = vpop.f32.mrb[38].mxu1  ;;  %v3843_v44 = vpop.permute.xlu1 %1811 }
 0x2d0   : > { %v2412_v26 = vadd.f32 %v2382_v41, %v2380_v0  ;;  %v2224_v33 = vmul.f32 0.2, %v2689_v1  ;;  %v2691_v53 = vadd.f32 %v2155_v37, %v1772_v63  ;;  %v2157_v58 = vpop.f32.mrb[39].mxu1 }
 0x2d1   : > { %v2433_v38 = vadd.f32 %v2383_v45, %v2381_v29  ;;  %v2225_v20 = vmul.f32 0.2, %v2690_v35  ;;  %v2692_v27 = vadd.f32 %v2157_v58, %v1772_v63 }
 0x2d2   : > { %v2256_v28 = vmax.f32 %v2689_v1, %v2224_v33  ;;  %v2226_v50 = vmul.f32 0.2, %v2691_v53 }
 0x2d3   : > { %v2257_v47 = vmax.f32 %v2690_v35, %v2225_v20  ;;  %v2227_v19 = vmul.f32 0.2, %v2692_v27 }
 0x2d4   : > { %v2384_v57 = vmul.f32 %v2313_v3, %v2256_v28  ;;  %v2258_v43 = vmax.f32 %v2691_v53, %v2226_v50 }
 0x2d5   : > { %v2385_v62 = vmul.f32 %v2313_v3, %v2257_v47  ;;  %v2259_v55 = vmax.f32 %v2692_v27, %v2227_v19  ;;  %v2161_v2 = vpop.f32.mrb[40].mxu1 }
 0x2d6   : > { %v2413_v4 = vadd.f32 %v2412_v26, %v2384_v57  ;;  %v2386_v7 = vmul.f32 %v2318_v11, %v2258_v43  ;;  %v2693_v34 = vadd.f32 %v2161_v2, %v1777_v23  ;;  %v2163_v12 = vpop.f32.mrb[41].mxu1 }
 0x2d7   : > { %v2434_v17 = vadd.f32 %v2433_v38, %v2385_v62  ;;  %v2387_v25 = vmul.f32 %v2318_v11, %v2259_v55  ;;  %v2694_v32 = vadd.f32 %v2163_v12, %v1777_v23  ;;  %v2165_v24 = vpop.f32.mrb[42].mxu1  ;;  %v2338_v11 = vpop.permute.xlu0 %2337 }
 0x2d8   : > { %v2414_v9 = vadd.f32 %v2413_v4, %v2386_v7  ;;  %v2228_v63 = vmul.f32 0.2, %v2693_v34  ;;  %v2695_v21 = vadd.f32 %v2165_v24, %v3828_v5  ;;  %v2167_v51 = vpop.f32.mrb[43].mxu1 }
 0x2d9   : > { %v2435_v48 = vadd.f32 %v2434_v17, %v2387_v25  ;;  %v2229_v3 = vmul.f32 0.2, %v2694_v32  ;;  %v2696_v30 = vadd.f32 %v2167_v51, %v3828_v5 }
 0x2da   : > { %v2260_v40 = vmax.f32 %v2693_v34, %v2228_v63  ;;  %v2230_v49 = vmul.f32 0.2, %v2695_v21 }
 0x2db   : > { %v2261_v14 = vmax.f32 %v2694_v32, %v2229_v3  ;;  %v2231_v59 = vmul.f32 0.2, %v2696_v30  ;;  %v2343_v53 = vpop.permute.xlu0 %2342 }
 0x2dc   : > { %v2388_v13 = vmul.f32 %v2323_v61, %v2260_v40  ;;  %v2262_v22 = vmax.f32 %v2695_v21, %v2230_v49 }
 0x2dd   : > { %v2389_v23 = vmul.f32 %v2323_v61, %v2261_v14  ;;  %v2263_v31 = vmax.f32 %v2696_v30, %v2231_v59  ;;  %v2171_v46 = vpop.f32.mrb[44].mxu1 }
 0x2de   : > { %v2415_v56 = vadd.f32 %v2414_v9, %v2388_v13  ;;  %v2390_v60 = vmul.f32 %v2328_v36, %v2262_v22  ;;  %v2697_v18 = vadd.f32 %v2171_v46, %v3830_v39  ;;  %v2173_v52 = vpop.f32.mrb[45].mxu1 }
 0x2df   : > { %v2436_v10 = vadd.f32 %v2435_v48, %v2389_v23  ;;  %v2391_v0 = vmul.f32 %v2328_v36, %v2263_v31  ;;  %v2698_v5 = vadd.f32 %v2173_v52, %v3830_v39  ;;  %v2175_v41 = vpop.f32.mrb[46].mxu1  ;;  %v3848_v36 = vpop.permute.xlu1 %1816 }
 0x2e0   : > { %v2416_v1 = vadd.f32 %v2415_v56, %v2390_v60  ;;  %v2232_v15 = vmul.f32 0.2, %v2697_v18  ;;  %v2699_v29 = vadd.f32 %v2175_v41, %v3832_v8  ;;  %v2177_v45 = vpop.f32.mrb[47].mxu1  ;;  %v2348_v17 = vpop.permute.xlu0 %2347 }
 0x2e1   : > { %v2437_v61 = vadd.f32 %v2436_v10, %v2391_v0  ;;  %v2233_v35 = vmul.f32 0.2, %v2698_v5  ;;  %v2700_v37 = vadd.f32 %v2177_v45, %v3832_v8 }
 0x2e2   : > { %v2264_v26 = vmax.f32 %v2697_v18, %v2232_v15  ;;  %v2234_v33 = vmul.f32 0.2, %v2699_v29 }
 0x2e3   : > { %v2265_v58 = vmax.f32 %v2698_v5, %v2233_v35  ;;  %v2235_v38 = vmul.f32 0.2, %v2700_v37  ;;  %v1822_v63 = vpop.permute.xlu1 %1821 }
 0x2e4   : > { %v2392_v20 = vmul.f32 %v2333_v54, %v2264_v26  ;;  %v2266_v27 = vmax.f32 %v2699_v29, %v2234_v33  ;;  %v2353_v22 = vpop.permute.xlu0 %2352 }
 0x2e5   : > { %v2393_v39 = vmul.f32 %v2333_v54, %v2265_v58  ;;  %v2267_v28 = vmax.f32 %v2700_v37, %v2235_v38  ;;  %v2181_v50 = vpop.f32.mrb[48].mxu1 }
 0x2e6   : > { %v2417_v47 = vadd.f32 %v2416_v1, %v2392_v20  ;;  %v2394_v19 = vmul.f32 %v2338_v11, %v2266_v27  ;;  %v2701_v57 = vadd.f32 %v2181_v50, %v3834_v6  ;;  %v2183_v43 = vpop.f32.mrb[49].mxu1 }
 0x2e7   : > { %v2438_v62 = vadd.f32 %v2437_v61, %v2393_v39  ;;  %v2395_v55 = vmul.f32 %v2338_v11, %v2267_v28  ;;  %v2702_v8 = vadd.f32 %v2183_v43, %v3834_v6  ;;  %v2185_v2 = vpop.f32.mrb[50].mxu1  ;;  %v1827_v52 = vpop.permute.xlu1 %1826 }
 0x2e8   : > { %v2418_v4 = vadd.f32 %v2417_v47, %v2394_v19  ;;  %v2236_v7 = vmul.f32 0.2, %v2701_v57  ;;  %v2703_v34 = vadd.f32 %v2185_v2, %v3836_v16  ;;  %v2187_v12 = vpop.f32.mrb[51].mxu1  ;;  %v2358_v35 = vpop.permute.xlu0 %2357 }
 0x2e9   : > { %v2439_v25 = vadd.f32 %v2438_v62, %v2395_v55  ;;  %v2237_v54 = vmul.f32 0.2, %v2702_v8  ;;  %v2704_v32 = vadd.f32 %v2187_v12, %v3836_v16 }
 0x2ea   : > { %v2268_v24 = vmax.f32 %v2701_v57, %v2236_v7  ;;  %v2238_v9 = vmul.f32 0.2, %v2703_v34 }
 0x2eb   : > { %v2269_v21 = vmax.f32 %v2702_v8, %v2237_v54  ;;  %v2239_v51 = vmul.f32 0.2, %v2704_v32  ;;  %v1832_v20 = vpop.permute.xlu1 %1831 }
 0x2ec   : > { %v2396_v48 = vmul.f32 %v2343_v53, %v2268_v24  ;;  %v2270_v3 = vmax.f32 %v2703_v34, %v2238_v9 }
 0x2ed   : > { %v2397_v30 = vmul.f32 %v2343_v53, %v2269_v21  ;;  %v2271_v6 = vmax.f32 %v2704_v32, %v2239_v51  ;;  %v2191_v40 = vpop.f32.mrb[52].mxu1 }
 0x2ee   : > { %v2419_v49 = vadd.f32 %v2418_v4, %v2396_v48  ;;  %v2398_v14 = vmul.f32 %v2348_v17, %v2270_v3  ;;  %v2705_v59 = vadd.f32 %v2191_v40, %v3839_v42  ;;  %v2193_v13 = vpop.f32.mrb[53].mxu1  ;;  %v2363_v4 = vpop.permute.xlu0 %2362 }
 0x2ef   : > { %v2440_v11 = vadd.f32 %v2439_v25, %v2397_v30  ;;  %v2399_v23 = vmul.f32 %v2348_v17, %v2271_v6  ;;  %v2706_v16 = vadd.f32 %v2193_v13, %v3839_v42  ;;  %v2195_v31 = vpop.f32.mrb[54].mxu1  ;;  %v2368_v25 = vpop.permute.xlu1 %2367 }
 0x2f0   : > { %v2420_v46 = vadd.f32 %v2419_v49, %v2398_v14  ;;  %v2240_v56 = vmul.f32 0.2, %v2705_v59  ;;  %v2707_v60 = vadd.f32 %v2195_v31, %v3843_v44  ;;  %v2197_v18 = vpop.f32.mrb[55].mxu1 }
 0x2f1   : > { %v2441_v10 = vadd.f32 %v2440_v11, %v2399_v23  ;;  %v2241_v0 = vmul.f32 0.2, %v2706_v16  ;;  %v2708_v5 = vadd.f32 %v2197_v18, %v3843_v44 }
 0x2f2   : > { %v2272_v41 = vmax.f32 %v2705_v59, %v2240_v56  ;;  %v2242_v1 = vmul.f32 0.2, %v2707_v60 }
 0x2f3   : > { %v2273_v15 = vmax.f32 %v2706_v16, %v2241_v0  ;;  %v2243_v29 = vmul.f32 0.2, %v2708_v5  ;;  %v2373_v16 = vpop.permute.xlu0 %2372  ;;  %v2378_v18 = vpop.permute.xlu1 %2377 }
 0x2f4   : > { %v2400_v45 = vmul.f32 %v2353_v22, %v2272_v41  ;;  %v2274_v61 = vmax.f32 %v2707_v60, %v2242_v1 }
 0x2f5   : > { %v2401_v37 = vmul.f32 %v2353_v22, %v2273_v15  ;;  %v2275_v42 = vmax.f32 %v2708_v5, %v2243_v29  ;;  %v2201_v26 = vpop.f32.mrb[56].mxu1  ;;  %v2460_v15 = vlaneseq }
 0x2f6   : > { %v2421_v33 = vadd.f32 %v2420_v46, %v2400_v45  ;;  %v2402_v53 = vmul.f32 %v2358_v35, %v2274_v61  ;;  %v2709_v58 = vadd.f32 %v2201_v26, %v3848_v36  ;;  %v2203_v38 = vpop.f32.mrb[57].mxu1 }
 0x2f7   : > { %v2442_v27 = vadd.f32 %v2441_v10, %v2401_v37  ;;  %v2403_v39 = vmul.f32 %v2358_v35, %v2275_v42  ;;  %v2710_v44 = vadd.f32 %v2203_v38, %v3848_v36  ;;  %v2205_v28 = vpop.f32.mrb[58].mxu1  ;;  %v2461_v37 = vshrl.u32 %v2460_v15, 7 }
 0x2f8   : > { %v2422_v50 = vadd.f32 %v2421_v33, %v2402_v53  ;;  %v2244_v47 = vmul.f32 0.2, %v2709_v58  ;;  %v2711_v19 = vadd.f32 %v2205_v28, %v1822_v63  ;;  %v2207_v57 = vpop.f32.mrb[59].mxu1  ;;  %v2937_v53 = vmov 1966171168  }
 0x2f9   : > { %v2443_v43 = vadd.f32 %v2442_v27, %v2403_v39  ;;  %v2245_v62 = vmul.f32 0.2, %v2710_v44  ;;  %v2712_v55 = vadd.f32 %v2207_v57, %v1822_v63  ;;  %v2458_v39 = vpop.permute.xlu0 %2457  ;;  %vm2486_vm1 = vcmp.lt.s32.totalorder %v2460_v15, 256 }
 0x2fa   : > { %v2276_v8 = vmax.f32 %v2709_v58, %v2244_v47  ;;  %v2246_v2 = vmul.f32 0.2, %v2711_v19  ;;  %v2470_v58 = vunpack.c.l.s4 %v2937_v53 }
 0x2fb   : > { %v2277_v7 = vmax.f32 %v2710_v44, %v2245_v62  ;;  %v2247_v34 = vmul.f32 0.2, %v2712_v55 }
 0x2fc   : > { %v2404_v12 = vmul.f32 %v2363_v4, %v2276_v8  ;;  %v2278_v17 = vmax.f32 %v2711_v19, %v2246_v2 }
 0x2fd   : > { %v2405_v54 = vmul.f32 %v2363_v4, %v2277_v7  ;;  %v2279_v32 = vmax.f32 %v2712_v55, %v2247_v34  ;;  %v2211_v24 = vpop.f32.mrb[60].mxu1 }
 0x2fe   : > { %v2423_v36 = vadd.f32 %v2422_v50, %v2404_v12  ;;  %v2406_v9 = vmul.f32 %v2368_v25, %v2278_v17  ;;  %v2713_v21 = vadd.f32 %v2211_v24, %v1827_v52  ;;  %v2213_v51 = vpop.f32.mrb[61].mxu1  ;;  %v2471_v50 = vunpack.c.0.s8 %v2470_v58 }
 0x2ff   : > { %v2444_v48 = vadd.f32 %v2443_v43, %v2405_v54  ;;  %v2407_v3 = vmul.f32 %v2368_v25, %v2279_v32  ;;  %v2714_v30 = vadd.f32 %v2213_v51, %v1827_v52  ;;  %v2215_v6 = vpop.f32.mrb[62].mxu1 }
 0x300   : > { %v2424_v63 = vadd.f32 %v2423_v36, %v2406_v9  ;;  %v2248_v40 = vmul.f32 0.2, %v2713_v21  ;;  %v2715_v49 = vadd.f32 %v2215_v6, %v1832_v20  ;;  %v2217_v14 = vpop.f32.mrb[63].mxu1  ;;  %v2474_v55 = vsub.s32 %v2471_v50, %v2461_v37 }
 0x301   : > { %v2445_v59 = vadd.f32 %v2444_v48, %v2407_v3  ;;  %v2249_v13 = vmul.f32 0.2, %v2714_v30  ;;  %v2716_v22 = vadd.f32 %v2217_v14, %v1832_v20  ;;  %v2462_v20 = vsub.s32 0, %v2461_v37 }
 0x302   : > { %v2280_v11 = vmax.f32 %v2713_v21, %v2248_v40  ;;  %v2250_v23 = vmul.f32 0.2, %v2715_v49 }
 0x303   : > { %v2281_v31 = vmax.f32 %v2714_v30, %v2249_v13  ;;  %v2251_v46 = vmul.f32 0.2, %v2716_v22  ;;  %v2463_v19 = vrot.slane %v2458_v39, %v2462_v20 }
 0x304   : > { %v2408_v56 = vmul.f32 %v2373_v16, %v2280_v11  ;;  %v2282_v60 = vmax.f32 %v2715_v49, %v2250_v23 }
 0x305   : > { %v2409_v10 = vmul.f32 %v2373_v16, %v2281_v31  ;;  %v2283_v0 = vmax.f32 %v2716_v22, %v2251_v46 }
 0x306   : > { %v2425_v5 = vadd.f32 %v2424_v63, %v2408_v56  ;;  %v2410_v52 = vmul.f32 %v2378_v18, %v2282_v60 }
 0x307   : > { %v2446_v41 = vadd.f32 %v2445_v59, %v2409_v10  ;;  %v2411_v1 = vmul.f32 %v2378_v18, %v2283_v0 }
 0x308   : > { %v2426_v29 = vadd.f32 %v2425_v5, %v2410_v52 }
 0x309   : > { %v2447_v45 = vadd.f32 %v2446_v41, %v2411_v1 }
 0x30a   : > { %v2427_v61 = vrot.slane %v2426_v29, 4 }
 0x30b   : > { %v2448_v35 = vrot.slane %v2447_v45, 4 }
 0x30c   : > { %v2428_v42 = vadd.f32 %v2427_v61, %v2426_v29 }
 0x30d   : > { %v2449_v26 = vadd.f32 %v2448_v35, %v2447_v45 }
 0x30e   : > { %v2429_v33 = vrot.slane %v2428_v42, 2 }
 0x30f   : > { %v2450_v38 = vrot.slane %v2449_v26, 2 }
 0x310   : > { %v2430_v27 = vadd.f32 %v2429_v33, %v2428_v42 }
 0x311   : > { %v2451_v44 = vadd.f32 %v2450_v38, %v2449_v26 }
 0x312   : > { %v2431_v28 = vrot.slane %v2430_v27, 1 }
 0x313   : > { %v2452_v47 = vrot.slane %v2451_v44, 1 }
 0x314   : > { %v2432_v57 = vadd.f32 %v2431_v28, %v2430_v27 }
 0x315   : > { %v2453_v43 = vadd.f32 %v2452_v47, %v2451_v44 }
 0x316   : > { %v2464_v62 = vadd.f32 %v2463_v19, %v2432_v57 }
 0x317   : > { %v2465_v8 = vadd.f32 %v2463_v19, %v2453_v43 }
 0x319   : > { %v2468_v2 = vcombine.low %v2464_v62, %v2465_v8 }
 0x31b   : > { %v2475_v4 = vrot.slane %v2468_v2, %v2474_v55 }
 0x31d   : > { %v2482_v7 = vrot.slane %v2475_v4, %v2474_v55 }
 0x31f   : > { %2488 = vst.msk [vmem:[%s312_s23] sm:$0x3] %vm2486_vm1, %v2482_v7 }
 0x320   : > { %2885 = shalt.err (!%p2882_p5)
}
 0x321   : > { %s2886_s25 = scalar_lea.hbm %s3866_s10, 32  ;;  %s2890_s20 = scalar_lea.hbm %s3917_s7, 64 }
 0x322   : > { %p2887_p7 = scmp.ne.s32.totalorder %s3866_s10, %s2886_s25  ;;  %p2891_p12 = scmp.lt.u32.totalorder %s3866_s10, %s3917_s7 }
 0x323   : > { %p2892_p13 = scmp.lt.u32.totalorder %s2890_s20, %s2886_s25  ;;  %p2894_p1 = scmp.lt.u32.totalorder %s2886_s25, %s3866_s10 }
 0x324   : > { %p2888_p10 = pnand %p2887_p7, %p3020_p6 }
 0x325   : > { %p2893_p0 = por %p2892_p13, %p2891_p12 }
 0x326   : > { %p2889_p11 = pneg %p2888_p10 }
 0x327   : > { %p2895_p2 = por %p2894_p1, %p2893_p0 }
 0x329   : > { %p2896_p3 = pnand %p2895_p2, %p2889_p11 }
 0x32b   : > { %2899 = shalt.err (!%p2896_p3)
}
 0x32c   : > { %2749 = dma.vmem_to_hbm [thread:$0]  (%p3020_p6), %s3868_s24, 32, %s3866_s10, %s2490_s14  }
 0x32d PF: > { %s2516_s23 = sand.u32 1, %s2922_s26   ;;  %p2752_p4 = pnand %p2571_p9, %p3024_p8 }
 0x32e   : > { %s2517_s30 = scalar_lea.sflag [#allocation5], %s2516_s23 }
 0x32f   : > { %2917 = dma.done.wait (!%p2752_p4), %s2517_s30, 32  }
 0x330   : > { %2919 = vsyncadd (!%p2752_p4), %s2517_s30, 4294967264  ;;  %p19_p5 = scmp.ge.s32.totalorder %s3005_s8, 4   ;;  %s3965_s26 = smov %s2926_s27 }
 0x331   : > { %s3966_s27 = smov %s2930_s28  ;;  %s3967_s28 = smov %s3018_s11 }
 0x332   : > { %s3968_s29 = smov %s3005_s8  ;;  %21 = sbr.rel (!%p19_p5) target bundleno = 6 (0x6), region = 111 }
 0x339   :  { %2522 = vsyncpa [#allocation5], 1 }
 0x33a   :  { %2524 = vsyncpa [#allocation5 + $0x1], 1 }

</bundles_post_ra>
